<compile_context>
chip_gen: v7x
topology: tpu7x:2x2x1
jax: 0.10.0
libtpu: 0.0.40
codegen_flags: <defaults>
</compile_context>

<pallas_src>
import functools
import math

import jax
import jax.numpy as jnp
from jax import lax
from jax.experimental import pallas as pl
from jax.experimental.pallas import tpu as pltpu

# ---------------- model config (small, consistent with the module's structure) -------------------
HIDDEN = 32
NUM_HEADS = 4
HEAD_DIM = HIDDEN // NUM_HEADS
FF_DIM = 64
NUM_LAYERS = 2
EPS = 1e-5
NEG_INF = -1e9


# ---------------------------------- fused Pallas kernel ------------------------------------------
def encoder_kernel(x_ref, mask_ref,
                   wqkv_ref, bqkv_ref, wo_ref, bo_ref,
                   w1_ref, b1_ref, w2_ref, b2_ref,
                   ln1g_ref, ln1b_ref, ln2g_ref, ln2b_ref,
                   fing_ref, finb_ref,
                   out_ref,
                   *, num_heads, seq):
    """Full TransformerEncoder forward for the whole batch in one kernel invocation.

    x:    (B*S, H)   activations, batch folded into sublanes
    mask: (S, S)     1 = attend, 0 = masked (shared across batch and layers)
    weights stacked with a leading num_layers axis; everything stays VMEM-resident.
    """
    bs, hidden = x_ref.shape
    batch = bs // seq
    num_layers = wqkv_ref.shape[0]
    head_dim = hidden // num_heads
    scale = 1.0 / math.sqrt(head_dim)

    def layer_norm(r, g, b):
        mean = jnp.mean(r, axis=-1, keepdims=True)
        d = r - mean
        var = jnp.mean(d * d, axis=-1, keepdims=True)     # biased variance == nn.LayerNorm
        return d * jax.lax.rsqrt(var + EPS) * g + b

    x = x_ref[...].astype(jnp.float32)                    # (B*S, H)

    # additive mask bias computed ONCE and hoisted out of all layer/batch/head loops;
    # tiled along sublanes to match the stacked (B*num_heads*S, S) softmax slab.
    bias = jnp.where(mask_ref[...] > 0, 0.0, NEG_INF)     # (S, S)
    bias_slab = jnp.tile(bias, (batch * num_heads, 1))    # (B*H*S, S)

    for l in range(num_layers):                           # static unroll (tiny layer count)
        # ---------------- self-attention ----------------
        qkv = jnp.dot(x, wqkv_ref[l], preferred_element_type=jnp.float32) + bqkv_ref[l]
        q = qkv[:, 0 * hidden:1 * hidden] * scale         # pre-scale q once per layer
        k = qkv[:, 1 * hidden:2 * hidden]
        v = qkv[:, 2 * hidden:3 * hidden]

        # per-(batch, head) score tiles (tiny MXU pushes), stacked along sublanes
        score_blocks = []
        for b in range(batch):                            # static: attention is per batch element
            rows = slice(b * seq, (b + 1) * seq)
            qb, kb = q[rows], k[rows]                     # (S, H)
            for h in range(num_heads):                    # static head loop
                cols = slice(h * head_dim, (h + 1) * head_dim)
                # q @ k^T via dot_general (contract last dims) -- no materialized transpose
                score_blocks.append(
                    lax.dot_general(qb[:, cols], kb[:, cols], (((1,), (1,)), ((), ())),
                                    preferred_element_type=jnp.float32))       # (S, S)
        scores = jnp.concatenate(score_blocks, axis=0)    # (B*H*S, S)

        # ONE batched softmax over all (batch, head) pairs
        scores = scores + bias_slab
        scores = scores - jnp.max(scores, axis=-1, keepdims=True)
        p = jnp.exp(scores)
        # approx reciprocal on the EUP; passes 1e-2 parity (use approx=False for bit-tightness)
        p = p * pl.reciprocal(jnp.sum(p, axis=-1, keepdims=True), approx=True)

        # per-(batch, head) context, reassembled to one (B*S, H) ctx held in vregs
        ctx_rows = []
        for b in range(batch):
            rows = slice(b * seq, (b + 1) * seq)
            vb = v[rows]                                  # (S, H)
            head_ctx = []
            for h in range(num_heads):
                cols = slice(h * head_dim, (h + 1) * head_dim)
                r0 = (b * num_heads + h) * seq
                ph = p[r0:r0 + seq, :]                    # (S, S) probs for this (b, h)
                head_ctx.append(jnp.dot(ph, vb[:, cols],
                                        preferred_element_type=jnp.float32))   # (S, dh)
            ctx_rows.append(jnp.concatenate(head_ctx, axis=1))                 # (S, H)
        ctx = jnp.concatenate(ctx_rows, axis=0)           # (B*S, H)

        # ONE output projection per layer (no per-head Wo row-block folds, no scratch store)
        attn = jnp.dot(ctx, wo_ref[l], preferred_element_type=jnp.float32) + bo_ref[l]

        # residual + attention LayerNorm
        x = layer_norm(x + attn, ln1g_ref[l], ln1b_ref[l])

        # ---------------- feed-forward ----------------
        hmid = jnp.dot(x, w1_ref[l], preferred_element_type=jnp.float32) + b1_ref[l]
        hmid = jnp.maximum(hmid, 0.0)
        ff = jnp.dot(hmid, w2_ref[l], preferred_element_type=jnp.float32) + b2_ref[l]

        # residual + FFN LayerNorm
        x = layer_norm(x + ff, ln2g_ref[l], ln2b_ref[l])

    # final encoder LayerNorm (pure LN path)
    x = layer_norm(x, fing_ref[...], finb_ref[...])
    out_ref[...] = x.astype(out_ref.dtype)


# ---------------------------------- pallas_call wrapper ------------------------------------------
def transformer_encoder(x, mask, params):
    B, S, H = x.shape
    x2 = x.reshape(B * S, H)                              # fold batch into sublanes (free in XLA)
    kernel = functools.partial(encoder_kernel, num_heads=NUM_HEADS, seq=S)
    vmem_spec = pl.BlockSpec(memory_space=pltpu.MemorySpace.VMEM)
    out2 = pl.pallas_call(
        kernel,
        out_shape=jax.ShapeDtypeStruct((B * S, H), x.dtype),
        in_specs=[vmem_spec] * 16,                        # pin every operand VMEM-resident
        out_specs=vmem_spec,
    )(x2, mask,
      params["wqkv"], params["bqkv"], params["wo"], params["bo"],
      params["w1"], params["b1"], params["w2"], params["b2"],
      params["ln1_g"], params["ln1_b"], params["ln2_g"], params["ln2_b"],
      params["final_g"], params["final_b"])
    return out2.reshape(B, S, H)


# ---------------------------------- pure-JAX reference (sanity check) ----------------------------
def ref_ln(x, g, b):
    m = x.mean(-1, keepdims=True)
    v = ((x - m) ** 2).mean(-1, keepdims=True)
    return (x - m) * jax.lax.rsqrt(v + EPS) * g + b


def ref_encoder(x, mask, params):
    B, S, H = x.shape
    dh = H // NUM_HEADS
    bias = jnp.where(mask > 0, 0.0, NEG_INF)
    num_layers = params["wqkv"].shape[0]
    for l in range(num_layers):
        qkv = x @ params["wqkv"][l] + params["bqkv"][l][0]
        q, k, v = qkv[..., :H], qkv[..., H:2 * H], qkv[..., 2 * H:]
        q = q.reshape(B, S, NUM_HEADS, dh).transpose(0, 2, 1, 3)
        k = k.reshape(B, S, NUM_HEADS, dh).transpose(0, 2, 1, 3)
        v = v.reshape(B, S, NUM_HEADS, dh).transpose(0, 2, 1, 3)
        s = jnp.einsum("bhqd,bhkd->bhqk", q, k) / math.sqrt(dh)
        s = s + bias[None, None]
        p = jax.nn.softmax(s, axis=-1)
        ctx = jnp.einsum("bhqk,bhkd->bhqd", p, v).transpose(0, 2, 1, 3).reshape(B, S, H)
        attn = ctx @ params["wo"][l] + params["bo"][l][0]
        x = ref_ln(x + attn, params["ln1_g"][l], params["ln1_b"][l])
        ff = (jnp.maximum(x @ params["w1"][l] + params["b1"][l][0], 0.0)
              @ params["w2"][l] + params["b2"][l][0])
        x = ref_ln(x + ff, params["ln2_g"][l], params["ln2_b"][l])
    return ref_ln(x, params["final_g"], params["final_b"])


# ---------------------------------- parameter init -----------------------------------------------
def init_params(key):
    ks = jax.random.split(key, 14)

    def n(k, shape, s=0.05):
        return jax.random.normal(k, shape, jnp.float32) * s

    L, H, F = NUM_LAYERS, HIDDEN, FF_DIM
    return {
        "wqkv": n(ks[0], (L, H, 3 * H)),        # fused Q/K/V weights
        "bqkv": n(ks[1], (L, 1, 3 * H)),
        "wo":   n(ks[2], (L, H, H)),
        "bo":   n(ks[3], (L, 1, H)),
        "w1":   n(ks[4], (L, H, F)),
        "b1":   n(ks[5], (L, 1, F)),
        "w2":   n(ks[6], (L, F, H)),
        "b2":   n(ks[7], (L, 1, H)),
        "ln1_g": 1.0 + n(ks[8], (L, 1, H), 0.1),
        "ln1_b": n(ks[9], (L, 1, H), 0.1),
        "ln2_g": 1.0 + n(ks[10], (L, 1, H), 0.1),
        "ln2_b": n(ks[11], (L, 1, H), 0.1),
        "final_g": 1.0 + n(ks[12], (1, H), 0.1),
        "final_b": n(ks[13], (1, H), 0.1),
    }


# ---------------------------------- main ----------------------------------------------------------
if __name__ == "__main__":
    B, SEQ = 2, 8

    key = jax.random.PRNGKey(0)
    key, kx, kp = jax.random.split(key, 3)
    x = jax.random.normal(kx, (B, SEQ, HIDDEN), jnp.float32)

    # padding-style mask shared across the batch: last two key positions are masked out
    mask = jnp.concatenate(
        [jnp.ones((SEQ, SEQ - 2), jnp.float32), jnp.zeros((SEQ, 2), jnp.float32)], axis=1)

    params = init_params(kp)

    fwd = jax.jit(transformer_encoder)
    out = jax.block_until_ready(fwd(x, mask, params))

    ref = ref_encoder(x, mask, params)
    assert out.shape == (B, SEQ, HIDDEN)
    assert jnp.allclose(out, ref, atol=1e-2, rtol=1e-2), float(jnp.max(jnp.abs(out - ref)))

    print("KERNEL_OK")
</pallas_src>

<mosaic_0001>
module attributes {stable_mosaic.version = 11 : i64} {
  func.func @encoder_kernel(%arg0: memref<16x32xf32, #tpu.memory_space<vmem>>, %arg1: memref<8x8xf32, #tpu.memory_space<vmem>>, %arg2: memref<2x32x96xf32, #tpu.memory_space<vmem>>, %arg3: memref<2x1x96xf32, #tpu.memory_space<vmem>>, %arg4: memref<2x32x32xf32, #tpu.memory_space<vmem>>, %arg5: memref<2x1x32xf32, #tpu.memory_space<vmem>>, %arg6: memref<2x32x64xf32, #tpu.memory_space<vmem>>, %arg7: memref<2x1x64xf32, #tpu.memory_space<vmem>>, %arg8: memref<2x64x32xf32, #tpu.memory_space<vmem>>, %arg9: memref<2x1x32xf32, #tpu.memory_space<vmem>>, %arg10: memref<2x1x32xf32, #tpu.memory_space<vmem>>, %arg11: memref<2x1x32xf32, #tpu.memory_space<vmem>>, %arg12: memref<2x1x32xf32, #tpu.memory_space<vmem>>, %arg13: memref<2x1x32xf32, #tpu.memory_space<vmem>>, %arg14: memref<1x32xf32, #tpu.memory_space<vmem>>, %arg15: memref<1x32xf32, #tpu.memory_space<vmem>>, %arg16: memref<16x32xf32, #tpu.memory_space<vmem>>) attributes {dimension_semantics = [], scalar_prefetch = 0 : i64, scratch_operands = 0 : i64, tpu.core_type = #tpu.core_type<tc>} {
    %c0 = arith.constant 0 : index
    %c0_0 = arith.constant 0 : index
    %0 = vector.load %arg0[%c0, %c0_0] : memref<16x32xf32, #tpu.memory_space<vmem>>, vector<16x32xf32>
    %c0_1 = arith.constant 0 : index
    %c0_2 = arith.constant 0 : index
    %1 = vector.load %arg1[%c0_1, %c0_2] : memref<8x8xf32, #tpu.memory_space<vmem>>, vector<8x8xf32>
    %cst = arith.constant 0.000000e+00 : f32
    %2 = vector.broadcast %cst : f32 to vector<8x8xf32>
    %3 = arith.cmpf ogt, %1, %2 : vector<8x8xf32>
    %cst_3 = arith.constant 0.000000e+00 : f32
    %cst_4 = arith.constant -1.000000e+09 : f32
    %4 = vector.broadcast %cst_3 : f32 to vector<8x8xf32>
    %5 = vector.broadcast %cst_4 : f32 to vector<8x8xf32>
    %6 = arith.select %3, %4, %5 : vector<8x8xi1>, vector<8x8xf32>
    %7 = tpu.concatenate %6, %6, %6, %6, %6, %6, %6, %6 in 0 : vector<8x8xf32>, vector<8x8xf32>, vector<8x8xf32>, vector<8x8xf32>, vector<8x8xf32>, vector<8x8xf32>, vector<8x8xf32>, vector<8x8xf32> -> vector<64x8xf32>
    %c0_5 = arith.constant 0 : index
    %c0_6 = arith.constant 0 : index
    %c0_7 = arith.constant 0 : index
    %8 = vector.load %arg2[%c0_5, %c0_6, %c0_7] : memref<2x32x96xf32, #tpu.memory_space<vmem>>, vector<1x32x96xf32>
    %9 = vector.shape_cast %8 : vector<1x32x96xf32> to vector<32x96xf32>
    %cst_8 = arith.constant dense<0.000000e+00> : vector<16x96xf32>
    %10 = tpu.matmul %0, %9, %cst_8 {dimension_numbers = #tpu.dot_dimension_numbers<[1], [0], [0], [1], [0, 0, 1, 1], [], []>} : vector<16x32xf32>, vector<32x96xf32>, vector<16x96xf32> -> vector<16x96xf32>
    %c0_9 = arith.constant 0 : index
    %c0_10 = arith.constant 0 : index
    %c0_11 = arith.constant 0 : index
    %11 = vector.load %arg3[%c0_9, %c0_10, %c0_11] : memref<2x1x96xf32, #tpu.memory_space<vmem>>, vector<1x1x96xf32>
    %12 = vector.shape_cast %11 : vector<1x1x96xf32> to vector<1x96xf32>
    %13 = vector.broadcast %12 : vector<1x96xf32> to vector<16x96xf32>
    %14 = arith.addf %10, %13 : vector<16x96xf32>
    %15 = vector.extract_strided_slice %14 {offsets = [0, 0], sizes = [16, 32], strides = [1, 1]} : vector<16x96xf32> to vector<16x32xf32>
    %cst_12 = arith.constant 0.353553385 : f32
    %16 = vector.broadcast %cst_12 : f32 to vector<16x32xf32>
    %17 = arith.mulf %15, %16 : vector<16x32xf32>
    %18 = vector.extract_strided_slice %14 {offsets = [0, 32], sizes = [16, 32], strides = [1, 1]} : vector<16x96xf32> to vector<16x32xf32>
    %19 = vector.extract_strided_slice %14 {offsets = [0, 64], sizes = [16, 32], strides = [1, 1]} : vector<16x96xf32> to vector<16x32xf32>
    %20 = vector.extract_strided_slice %17 {offsets = [0, 0], sizes = [8, 32], strides = [1, 1]} : vector<16x32xf32> to vector<8x32xf32>
    %21 = vector.extract_strided_slice %18 {offsets = [0, 0], sizes = [8, 32], strides = [1, 1]} : vector<16x32xf32> to vector<8x32xf32>
    %22 = vector.extract_strided_slice %20 {offsets = [0, 0], sizes = [8, 8], strides = [1, 1]} : vector<8x32xf32> to vector<8x8xf32>
    %23 = vector.extract_strided_slice %21 {offsets = [0, 0], sizes = [8, 8], strides = [1, 1]} : vector<8x32xf32> to vector<8x8xf32>
    %cst_13 = arith.constant dense<0.000000e+00> : vector<8x8xf32>
    %24 = tpu.matmul %22, %23, %cst_13 {dimension_numbers = #tpu.dot_dimension_numbers<[1], [1], [0], [0], [0, 0, 1, 0], [], []>} : vector<8x8xf32>, vector<8x8xf32>, vector<8x8xf32> -> vector<8x8xf32>
    %25 = vector.extract_strided_slice %20 {offsets = [0, 8], sizes = [8, 8], strides = [1, 1]} : vector<8x32xf32> to vector<8x8xf32>
    %26 = vector.extract_strided_slice %21 {offsets = [0, 8], sizes = [8, 8], strides = [1, 1]} : vector<8x32xf32> to vector<8x8xf32>
    %cst_14 = arith.constant dense<0.000000e+00> : vector<8x8xf32>
    %27 = tpu.matmul %25, %26, %cst_14 {dimension_numbers = #tpu.dot_dimension_numbers<[1], [1], [0], [0], [0, 0, 1, 0], [], []>} : vector<8x8xf32>, vector<8x8xf32>, vector<8x8xf32> -> vector<8x8xf32>
    %28 = vector.extract_strided_slice %20 {offsets = [0, 16], sizes = [8, 8], strides = [1, 1]} : vector<8x32xf32> to vector<8x8xf32>
    %29 = vector.extract_strided_slice %21 {offsets = [0, 16], sizes = [8, 8], strides = [1, 1]} : vector<8x32xf32> to vector<8x8xf32>
    %cst_15 = arith.constant dense<0.000000e+00> : vector<8x8xf32>
    %30 = tpu.matmul %28, %29, %cst_15 {dimension_numbers = #tpu.dot_dimension_numbers<[1], [1], [0], [0], [0, 0, 1, 0], [], []>} : vector<8x8xf32>, vector<8x8xf32>, vector<8x8xf32> -> vector<8x8xf32>
    %31 = vector.extract_strided_slice %20 {offsets = [0, 24], sizes = [8, 8], strides = [1, 1]} : vector<8x32xf32> to vector<8x8xf32>
    %32 = vector.extract_strided_slice %21 {offsets = [0, 24], sizes = [8, 8], strides = [1, 1]} : vector<8x32xf32> to vector<8x8xf32>
    %cst_16 = arith.constant dense<0.000000e+00> : vector<8x8xf32>
    %33 = tpu.matmul %31, %32, %cst_16 {dimension_numbers = #tpu.dot_dimension_numbers<[1], [1], [0], [0], [0, 0, 1, 0], [], []>} : vector<8x8xf32>, vector<8x8xf32>, vector<8x8xf32> -> vector<8x8xf32>
    %34 = vector.extract_strided_slice %17 {offsets = [8, 0], sizes = [8, 32], strides = [1, 1]} : vector<16x32xf32> to vector<8x32xf32>
    %35 = vector.extract_strided_slice %18 {offsets = [8, 0], sizes = [8, 32], strides = [1, 1]} : vector<16x32xf32> to vector<8x32xf32>
    %36 = vector.extract_strided_slice %34 {offsets = [0, 0], sizes = [8, 8], strides = [1, 1]} : vector<8x32xf32> to vector<8x8xf32>
    %37 = vector.extract_strided_slice %35 {offsets = [0, 0], sizes = [8, 8], strides = [1, 1]} : vector<8x32xf32> to vector<8x8xf32>
    %cst_17 = arith.constant dense<0.000000e+00> : vector<8x8xf32>
    %38 = tpu.matmul %36, %37, %cst_17 {dimension_numbers = #tpu.dot_dimension_numbers<[1], [1], [0], [0], [0, 0, 1, 0], [], []>} : vector<8x8xf32>, vector<8x8xf32>, vector<8x8xf32> -> vector<8x8xf32>
    %39 = vector.extract_strided_slice %34 {offsets = [0, 8], sizes = [8, 8], strides = [1, 1]} : vector<8x32xf32> to vector<8x8xf32>
    %40 = vector.extract_strided_slice %35 {offsets = [0, 8], sizes = [8, 8], strides = [1, 1]} : vector<8x32xf32> to vector<8x8xf32>
    %cst_18 = arith.constant dense<0.000000e+00> : vector<8x8xf32>
    %41 = tpu.matmul %39, %40, %cst_18 {dimension_numbers = #tpu.dot_dimension_numbers<[1], [1], [0], [0], [0, 0, 1, 0], [], []>} : vector<8x8xf32>, vector<8x8xf32>, vector<8x8xf32> -> vector<8x8xf32>
    %42 = vector.extract_strided_slice %34 {offsets = [0, 16], sizes = [8, 8], strides = [1, 1]} : vector<8x32xf32> to vector<8x8xf32>
    %43 = vector.extract_strided_slice %35 {offsets = [0, 16], sizes = [8, 8], strides = [1, 1]} : vector<8x32xf32> to vector<8x8xf32>
    %cst_19 = arith.constant dense<0.000000e+00> : vector<8x8xf32>
    %44 = tpu.matmul %42, %43, %cst_19 {dimension_numbers = #tpu.dot_dimension_numbers<[1], [1], [0], [0], [0, 0, 1, 0], [], []>} : vector<8x8xf32>, vector<8x8xf32>, vector<8x8xf32> -> vector<8x8xf32>
    %45 = vector.extract_strided_slice %34 {offsets = [0, 24], sizes = [8, 8], strides = [1, 1]} : vector<8x32xf32> to vector<8x8xf32>
    %46 = vector.extract_strided_slice %35 {offsets = [0, 24], sizes = [8, 8], strides = [1, 1]} : vector<8x32xf32> to vector<8x8xf32>
    %cst_20 = arith.constant dense<0.000000e+00> : vector<8x8xf32>
    %47 = tpu.matmul %45, %46, %cst_20 {dimension_numbers = #tpu.dot_dimension_numbers<[1], [1], [0], [0], [0, 0, 1, 0], [], []>} : vector<8x8xf32>, vector<8x8xf32>, vector<8x8xf32> -> vector<8x8xf32>
    %48 = tpu.concatenate %24, %27, %30, %33, %38, %41, %44, %47 in 0 : vector<8x8xf32>, vector<8x8xf32>, vector<8x8xf32>, vector<8x8xf32>, vector<8x8xf32>, vector<8x8xf32>, vector<8x8xf32>, vector<8x8xf32> -> vector<64x8xf32>
    %49 = arith.addf %48, %7 : vector<64x8xf32>
    %cst_21 = arith.constant dense<0xFF800000> : vector<64xf32>
    %50 = vector.multi_reduction <maximumf>, %49, %cst_21 [1] : vector<64x8xf32> to vector<64xf32>
    %51 = vector.shape_cast %50 : vector<64xf32> to vector<64x1xf32>
    %52 = vector.broadcast %51 : vector<64x1xf32> to vector<64x8xf32>
    %53 = arith.subf %49, %52 : vector<64x8xf32>
    %54 = math.exp %53 : vector<64x8xf32>
    %cst_22 = arith.constant dense<0.000000e+00> : vector<64xf32>
    %55 = vector.multi_reduction <add>, %54, %cst_22 [1] : vector<64x8xf32> to vector<64xf32>
    %56 = vector.shape_cast %55 : vector<64xf32> to vector<64x1xf32>
    %57 = tpu.reciprocal %56 {approx = true} : vector<64x1xf32> -> vector<64x1xf32>
    %58 = vector.broadcast %57 : vector<64x1xf32> to vector<64x8xf32>
    %59 = arith.mulf %54, %58 : vector<64x8xf32>
    %60 = vector.extract_strided_slice %19 {offsets = [0, 0], sizes = [8, 32], strides = [1, 1]} : vector<16x32xf32> to vector<8x32xf32>
    %61 = vector.extract_strided_slice %59 {offsets = [0, 0], sizes = [8, 8], strides = [1, 1]} : vector<64x8xf32> to vector<8x8xf32>
    %62 = vector.extract_strided_slice %60 {offsets = [0, 0], sizes = [8, 8], strides = [1, 1]} : vector<8x32xf32> to vector<8x8xf32>
    %cst_23 = arith.constant dense<0.000000e+00> : vector<8x8xf32>
    %63 = tpu.matmul %61, %62, %cst_23 {dimension_numbers = #tpu.dot_dimension_numbers<[1], [0], [0], [1], [0, 0, 1, 1], [], []>} : vector<8x8xf32>, vector<8x8xf32>, vector<8x8xf32> -> vector<8x8xf32>
    %64 = vector.extract_strided_slice %59 {offsets = [8, 0], sizes = [8, 8], strides = [1, 1]} : vector<64x8xf32> to vector<8x8xf32>
    %65 = vector.extract_strided_slice %60 {offsets = [0, 8], sizes = [8, 8], strides = [1, 1]} : vector<8x32xf32> to vector<8x8xf32>
    %cst_24 = arith.constant dense<0.000000e+00> : vector<8x8xf32>
    %66 = tpu.matmul %64, %65, %cst_24 {dimension_numbers = #tpu.dot_dimension_numbers<[1], [0], [0], [1], [0, 0, 1, 1], [], []>} : vector<8x8xf32>, vector<8x8xf32>, vector<8x8xf32> -> vector<8x8xf32>
    %67 = vector.extract_strided_slice %59 {offsets = [16, 0], sizes = [8, 8], strides = [1, 1]} : vector<64x8xf32> to vector<8x8xf32>
    %68 = vector.extract_strided_slice %60 {offsets = [0, 16], sizes = [8, 8], strides = [1, 1]} : vector<8x32xf32> to vector<8x8xf32>
    %cst_25 = arith.constant dense<0.000000e+00> : vector<8x8xf32>
    %69 = tpu.matmul %67, %68, %cst_25 {dimension_numbers = #tpu.dot_dimension_numbers<[1], [0], [0], [1], [0, 0, 1, 1], [], []>} : vector<8x8xf32>, vector<8x8xf32>, vector<8x8xf32> -> vector<8x8xf32>
    %70 = vector.extract_strided_slice %59 {offsets = [24, 0], sizes = [8, 8], strides = [1, 1]} : vector<64x8xf32> to vector<8x8xf32>
    %71 = vector.extract_strided_slice %60 {offsets = [0, 24], sizes = [8, 8], strides = [1, 1]} : vector<8x32xf32> to vector<8x8xf32>
    %cst_26 = arith.constant dense<0.000000e+00> : vector<8x8xf32>
    %72 = tpu.matmul %70, %71, %cst_26 {dimension_numbers = #tpu.dot_dimension_numbers<[1], [0], [0], [1], [0, 0, 1, 1], [], []>} : vector<8x8xf32>, vector<8x8xf32>, vector<8x8xf32> -> vector<8x8xf32>
    %73 = tpu.concatenate %63, %66, %69, %72 in 1 : vector<8x8xf32>, vector<8x8xf32>, vector<8x8xf32>, vector<8x8xf32> -> vector<8x32xf32>
    %74 = vector.extract_strided_slice %19 {offsets = [8, 0], sizes = [8, 32], strides = [1, 1]} : vector<16x32xf32> to vector<8x32xf32>
    %75 = vector.extract_strided_slice %59 {offsets = [32, 0], sizes = [8, 8], strides = [1, 1]} : vector<64x8xf32> to vector<8x8xf32>
    %76 = vector.extract_strided_slice %74 {offsets = [0, 0], sizes = [8, 8], strides = [1, 1]} : vector<8x32xf32> to vector<8x8xf32>
    %cst_27 = arith.constant dense<0.000000e+00> : vector<8x8xf32>
    %77 = tpu.matmul %75, %76, %cst_27 {dimension_numbers = #tpu.dot_dimension_numbers<[1], [0], [0], [1], [0, 0, 1, 1], [], []>} : vector<8x8xf32>, vector<8x8xf32>, vector<8x8xf32> -> vector<8x8xf32>
    %78 = vector.extract_strided_slice %59 {offsets = [40, 0], sizes = [8, 8], strides = [1, 1]} : vector<64x8xf32> to vector<8x8xf32>
    %79 = vector.extract_strided_slice %74 {offsets = [0, 8], sizes = [8, 8], strides = [1, 1]} : vector<8x32xf32> to vector<8x8xf32>
    %cst_28 = arith.constant dense<0.000000e+00> : vector<8x8xf32>
    %80 = tpu.matmul %78, %79, %cst_28 {dimension_numbers = #tpu.dot_dimension_numbers<[1], [0], [0], [1], [0, 0, 1, 1], [], []>} : vector<8x8xf32>, vector<8x8xf32>, vector<8x8xf32> -> vector<8x8xf32>
    %81 = vector.extract_strided_slice %59 {offsets = [48, 0], sizes = [8, 8], strides = [1, 1]} : vector<64x8xf32> to vector<8x8xf32>
    %82 = vector.extract_strided_slice %74 {offsets = [0, 16], sizes = [8, 8], strides = [1, 1]} : vector<8x32xf32> to vector<8x8xf32>
    %cst_29 = arith.constant dense<0.000000e+00> : vector<8x8xf32>
    %83 = tpu.matmul %81, %82, %cst_29 {dimension_numbers = #tpu.dot_dimension_numbers<[1], [0], [0], [1], [0, 0, 1, 1], [], []>} : vector<8x8xf32>, vector<8x8xf32>, vector<8x8xf32> -> vector<8x8xf32>
    %84 = vector.extract_strided_slice %59 {offsets = [56, 0], sizes = [8, 8], strides = [1, 1]} : vector<64x8xf32> to vector<8x8xf32>
    %85 = vector.extract_strided_slice %74 {offsets = [0, 24], sizes = [8, 8], strides = [1, 1]} : vector<8x32xf32> to vector<8x8xf32>
    %cst_30 = arith.constant dense<0.000000e+00> : vector<8x8xf32>
    %86 = tpu.matmul %84, %85, %cst_30 {dimension_numbers = #tpu.dot_dimension_numbers<[1], [0], [0], [1], [0, 0, 1, 1], [], []>} : vector<8x8xf32>, vector<8x8xf32>, vector<8x8xf32> -> vector<8x8xf32>
    %87 = tpu.concatenate %77, %80, %83, %86 in 1 : vector<8x8xf32>, vector<8x8xf32>, vector<8x8xf32>, vector<8x8xf32> -> vector<8x32xf32>
    %88 = tpu.concatenate %73, %87 in 0 : vector<8x32xf32>, vector<8x32xf32> -> vector<16x32xf32>
    %c0_31 = arith.constant 0 : index
    %c0_32 = arith.constant 0 : index
    %c0_33 = arith.constant 0 : index
    %89 = vector.load %arg4[%c0_31, %c0_32, %c0_33] : memref<2x32x32xf32, #tpu.memory_space<vmem>>, vector<1x32x32xf32>
    %90 = vector.shape_cast %89 : vector<1x32x32xf32> to vector<32x32xf32>
    %cst_34 = arith.constant dense<0.000000e+00> : vector<16x32xf32>
    %91 = tpu.matmul %88, %90, %cst_34 {dimension_numbers = #tpu.dot_dimension_numbers<[1], [0], [0], [1], [0, 0, 1, 1], [], []>} : vector<16x32xf32>, vector<32x32xf32>, vector<16x32xf32> -> vector<16x32xf32>
    %c0_35 = arith.constant 0 : index
    %c0_36 = arith.constant 0 : index
    %c0_37 = arith.constant 0 : index
    %92 = vector.load %arg5[%c0_35, %c0_36, %c0_37] : memref<2x1x32xf32, #tpu.memory_space<vmem>>, vector<1x1x32xf32>
    %93 = vector.shape_cast %92 : vector<1x1x32xf32> to vector<1x32xf32>
    %94 = vector.broadcast %93 : vector<1x32xf32> to vector<16x32xf32>
    %95 = arith.addf %91, %94 : vector<16x32xf32>
    %96 = arith.addf %0, %95 : vector<16x32xf32>
    %c0_38 = arith.constant 0 : index
    %c0_39 = arith.constant 0 : index
    %c0_40 = arith.constant 0 : index
    %97 = vector.load %arg10[%c0_38, %c0_39, %c0_40] : memref<2x1x32xf32, #tpu.memory_space<vmem>>, vector<1x1x32xf32>
    %98 = vector.shape_cast %97 : vector<1x1x32xf32> to vector<1x32xf32>
    %c0_41 = arith.constant 0 : index
    %c0_42 = arith.constant 0 : index
    %c0_43 = arith.constant 0 : index
    %99 = vector.load %arg11[%c0_41, %c0_42, %c0_43] : memref<2x1x32xf32, #tpu.memory_space<vmem>>, vector<1x1x32xf32>
    %100 = vector.shape_cast %99 : vector<1x1x32xf32> to vector<1x32xf32>
    %cst_44 = arith.constant dense<0.000000e+00> : vector<16xf32>
    %101 = vector.multi_reduction <add>, %96, %cst_44 [1] : vector<16x32xf32> to vector<16xf32>
    %102 = vector.shape_cast %101 : vector<16xf32> to vector<16x1xf32>
    %cst_45 = arith.constant 3.200000e+01 : f32
    %103 = vector.broadcast %cst_45 : f32 to vector<16x1xf32>
    %104 = arith.divf %102, %103 : vector<16x1xf32>
    %105 = vector.broadcast %104 : vector<16x1xf32> to vector<16x32xf32>
    %106 = arith.subf %96, %105 : vector<16x32xf32>
    %107 = arith.mulf %106, %106 : vector<16x32xf32>
    %cst_46 = arith.constant dense<0.000000e+00> : vector<16xf32>
    %108 = vector.multi_reduction <add>, %107, %cst_46 [1] : vector<16x32xf32> to vector<16xf32>
    %109 = vector.shape_cast %108 : vector<16xf32> to vector<16x1xf32>
    %cst_47 = arith.constant 3.200000e+01 : f32
    %110 = vector.broadcast %cst_47 : f32 to vector<16x1xf32>
    %111 = arith.divf %109, %110 : vector<16x1xf32>
    %cst_48 = arith.constant 9.99999974E-6 : f32
    %112 = vector.broadcast %cst_48 : f32 to vector<16x1xf32>
    %113 = arith.addf %111, %112 : vector<16x1xf32>
    %114 = math.rsqrt %113 : vector<16x1xf32>
    %115 = vector.broadcast %114 : vector<16x1xf32> to vector<16x32xf32>
    %116 = arith.mulf %106, %115 : vector<16x32xf32>
    %117 = vector.broadcast %98 : vector<1x32xf32> to vector<16x32xf32>
    %118 = arith.mulf %116, %117 : vector<16x32xf32>
    %119 = vector.broadcast %100 : vector<1x32xf32> to vector<16x32xf32>
    %120 = arith.addf %118, %119 : vector<16x32xf32>
    %c0_49 = arith.constant 0 : index
    %c0_50 = arith.constant 0 : index
    %c0_51 = arith.constant 0 : index
    %121 = vector.load %arg6[%c0_49, %c0_50, %c0_51] : memref<2x32x64xf32, #tpu.memory_space<vmem>>, vector<1x32x64xf32>
    %122 = vector.shape_cast %121 : vector<1x32x64xf32> to vector<32x64xf32>
    %cst_52 = arith.constant dense<0.000000e+00> : vector<16x64xf32>
    %123 = tpu.matmul %120, %122, %cst_52 {dimension_numbers = #tpu.dot_dimension_numbers<[1], [0], [0], [1], [0, 0, 1, 1], [], []>} : vector<16x32xf32>, vector<32x64xf32>, vector<16x64xf32> -> vector<16x64xf32>
    %c0_53 = arith.constant 0 : index
    %c0_54 = arith.constant 0 : index
    %c0_55 = arith.constant 0 : index
    %124 = vector.load %arg7[%c0_53, %c0_54, %c0_55] : memref<2x1x64xf32, #tpu.memory_space<vmem>>, vector<1x1x64xf32>
    %125 = vector.shape_cast %124 : vector<1x1x64xf32> to vector<1x64xf32>
    %126 = vector.broadcast %125 : vector<1x64xf32> to vector<16x64xf32>
    %127 = arith.addf %123, %126 : vector<16x64xf32>
    %cst_56 = arith.constant 0.000000e+00 : f32
    %128 = vector.broadcast %cst_56 : f32 to vector<16x64xf32>
    %129 = arith.maximumf %127, %128 : vector<16x64xf32>
    %c0_57 = arith.constant 0 : index
    %c0_58 = arith.constant 0 : index
    %c0_59 = arith.constant 0 : index
    %130 = vector.load %arg8[%c0_57, %c0_58, %c0_59] : memref<2x64x32xf32, #tpu.memory_space<vmem>>, vector<1x64x32xf32>
    %131 = vector.shape_cast %130 : vector<1x64x32xf32> to vector<64x32xf32>
    %cst_60 = arith.constant dense<0.000000e+00> : vector<16x32xf32>
    %132 = tpu.matmul %129, %131, %cst_60 {dimension_numbers = #tpu.dot_dimension_numbers<[1], [0], [0], [1], [0, 0, 1, 1], [], []>} : vector<16x64xf32>, vector<64x32xf32>, vector<16x32xf32> -> vector<16x32xf32>
    %c0_61 = arith.constant 0 : index
    %c0_62 = arith.constant 0 : index
    %c0_63 = arith.constant 0 : index
    %133 = vector.load %arg9[%c0_61, %c0_62, %c0_63] : memref<2x1x32xf32, #tpu.memory_space<vmem>>, vector<1x1x32xf32>
    %134 = vector.shape_cast %133 : vector<1x1x32xf32> to vector<1x32xf32>
    %135 = vector.broadcast %134 : vector<1x32xf32> to vector<16x32xf32>
    %136 = arith.addf %132, %135 : vector<16x32xf32>
    %137 = arith.addf %120, %136 : vector<16x32xf32>
    %c0_64 = arith.constant 0 : index
    %c0_65 = arith.constant 0 : index
    %c0_66 = arith.constant 0 : index
    %138 = vector.load %arg12[%c0_64, %c0_65, %c0_66] : memref<2x1x32xf32, #tpu.memory_space<vmem>>, vector<1x1x32xf32>
    %139 = vector.shape_cast %138 : vector<1x1x32xf32> to vector<1x32xf32>
    %c0_67 = arith.constant 0 : index
    %c0_68 = arith.constant 0 : index
    %c0_69 = arith.constant 0 : index
    %140 = vector.load %arg13[%c0_67, %c0_68, %c0_69] : memref<2x1x32xf32, #tpu.memory_space<vmem>>, vector<1x1x32xf32>
    %141 = vector.shape_cast %140 : vector<1x1x32xf32> to vector<1x32xf32>
    %cst_70 = arith.constant dense<0.000000e+00> : vector<16xf32>
    %142 = vector.multi_reduction <add>, %137, %cst_70 [1] : vector<16x32xf32> to vector<16xf32>
    %143 = vector.shape_cast %142 : vector<16xf32> to vector<16x1xf32>
    %cst_71 = arith.constant 3.200000e+01 : f32
    %144 = vector.broadcast %cst_71 : f32 to vector<16x1xf32>
    %145 = arith.divf %143, %144 : vector<16x1xf32>
    %146 = vector.broadcast %145 : vector<16x1xf32> to vector<16x32xf32>
    %147 = arith.subf %137, %146 : vector<16x32xf32>
    %148 = arith.mulf %147, %147 : vector<16x32xf32>
    %cst_72 = arith.constant dense<0.000000e+00> : vector<16xf32>
    %149 = vector.multi_reduction <add>, %148, %cst_72 [1] : vector<16x32xf32> to vector<16xf32>
    %150 = vector.shape_cast %149 : vector<16xf32> to vector<16x1xf32>
    %cst_73 = arith.constant 3.200000e+01 : f32
    %151 = vector.broadcast %cst_73 : f32 to vector<16x1xf32>
    %152 = arith.divf %150, %151 : vector<16x1xf32>
    %cst_74 = arith.constant 9.99999974E-6 : f32
    %153 = vector.broadcast %cst_74 : f32 to vector<16x1xf32>
    %154 = arith.addf %152, %153 : vector<16x1xf32>
    %155 = math.rsqrt %154 : vector<16x1xf32>
    %156 = vector.broadcast %155 : vector<16x1xf32> to vector<16x32xf32>
    %157 = arith.mulf %147, %156 : vector<16x32xf32>
    %158 = vector.broadcast %139 : vector<1x32xf32> to vector<16x32xf32>
    %159 = arith.mulf %157, %158 : vector<16x32xf32>
    %160 = vector.broadcast %141 : vector<1x32xf32> to vector<16x32xf32>
    %161 = arith.addf %159, %160 : vector<16x32xf32>
    %c1 = arith.constant 1 : index
    %c0_75 = arith.constant 0 : index
    %c0_76 = arith.constant 0 : index
    %162 = vector.load %arg2[%c1, %c0_75, %c0_76] : memref<2x32x96xf32, #tpu.memory_space<vmem>>, vector<1x32x96xf32>
    %163 = vector.shape_cast %162 : vector<1x32x96xf32> to vector<32x96xf32>
    %cst_77 = arith.constant dense<0.000000e+00> : vector<16x96xf32>
    %164 = tpu.matmul %161, %163, %cst_77 {dimension_numbers = #tpu.dot_dimension_numbers<[1], [0], [0], [1], [0, 0, 1, 1], [], []>} : vector<16x32xf32>, vector<32x96xf32>, vector<16x96xf32> -> vector<16x96xf32>
    %c1_78 = arith.constant 1 : index
    %c0_79 = arith.constant 0 : index
    %c0_80 = arith.constant 0 : index
    %165 = vector.load %arg3[%c1_78, %c0_79, %c0_80] : memref<2x1x96xf32, #tpu.memory_space<vmem>>, vector<1x1x96xf32>
    %166 = vector.shape_cast %165 : vector<1x1x96xf32> to vector<1x96xf32>
    %167 = vector.broadcast %166 : vector<1x96xf32> to vector<16x96xf32>
    %168 = arith.addf %164, %167 : vector<16x96xf32>
    %169 = vector.extract_strided_slice %168 {offsets = [0, 0], sizes = [16, 32], strides = [1, 1]} : vector<16x96xf32> to vector<16x32xf32>
    %cst_81 = arith.constant 0.353553385 : f32
    %170 = vector.broadcast %cst_81 : f32 to vector<16x32xf32>
    %171 = arith.mulf %169, %170 : vector<16x32xf32>
    %172 = vector.extract_strided_slice %168 {offsets = [0, 32], sizes = [16, 32], strides = [1, 1]} : vector<16x96xf32> to vector<16x32xf32>
    %173 = vector.extract_strided_slice %168 {offsets = [0, 64], sizes = [16, 32], strides = [1, 1]} : vector<16x96xf32> to vector<16x32xf32>
    %174 = vector.extract_strided_slice %171 {offsets = [0, 0], sizes = [8, 32], strides = [1, 1]} : vector<16x32xf32> to vector<8x32xf32>
    %175 = vector.extract_strided_slice %172 {offsets = [0, 0], sizes = [8, 32], strides = [1, 1]} : vector<16x32xf32> to vector<8x32xf32>
    %176 = vector.extract_strided_slice %174 {offsets = [0, 0], sizes = [8, 8], strides = [1, 1]} : vector<8x32xf32> to vector<8x8xf32>
    %177 = vector.extract_strided_slice %175 {offsets = [0, 0], sizes = [8, 8], strides = [1, 1]} : vector<8x32xf32> to vector<8x8xf32>
    %cst_82 = arith.constant dense<0.000000e+00> : vector<8x8xf32>
    %178 = tpu.matmul %176, %177, %cst_82 {dimension_numbers = #tpu.dot_dimension_numbers<[1], [1], [0], [0], [0, 0, 1, 0], [], []>} : vector<8x8xf32>, vector<8x8xf32>, vector<8x8xf32> -> vector<8x8xf32>
    %179 = vector.extract_strided_slice %174 {offsets = [0, 8], sizes = [8, 8], strides = [1, 1]} : vector<8x32xf32> to vector<8x8xf32>
    %180 = vector.extract_strided_slice %175 {offsets = [0, 8], sizes = [8, 8], strides = [1, 1]} : vector<8x32xf32> to vector<8x8xf32>
    %cst_83 = arith.constant dense<0.000000e+00> : vector<8x8xf32>
    %181 = tpu.matmul %179, %180, %cst_83 {dimension_numbers = #tpu.dot_dimension_numbers<[1], [1], [0], [0], [0, 0, 1, 0], [], []>} : vector<8x8xf32>, vector<8x8xf32>, vector<8x8xf32> -> vector<8x8xf32>
    %182 = vector.extract_strided_slice %174 {offsets = [0, 16], sizes = [8, 8], strides = [1, 1]} : vector<8x32xf32> to vector<8x8xf32>
    %183 = vector.extract_strided_slice %175 {offsets = [0, 16], sizes = [8, 8], strides = [1, 1]} : vector<8x32xf32> to vector<8x8xf32>
    %cst_84 = arith.constant dense<0.000000e+00> : vector<8x8xf32>
    %184 = tpu.matmul %182, %183, %cst_84 {dimension_numbers = #tpu.dot_dimension_numbers<[1], [1], [0], [0], [0, 0, 1, 0], [], []>} : vector<8x8xf32>, vector<8x8xf32>, vector<8x8xf32> -> vector<8x8xf32>
    %185 = vector.extract_strided_slice %174 {offsets = [0, 24], sizes = [8, 8], strides = [1, 1]} : vector<8x32xf32> to vector<8x8xf32>
    %186 = vector.extract_strided_slice %175 {offsets = [0, 24], sizes = [8, 8], strides = [1, 1]} : vector<8x32xf32> to vector<8x8xf32>
    %cst_85 = arith.constant dense<0.000000e+00> : vector<8x8xf32>
    %187 = tpu.matmul %185, %186, %cst_85 {dimension_numbers = #tpu.dot_dimension_numbers<[1], [1], [0], [0], [0, 0, 1, 0], [], []>} : vector<8x8xf32>, vector<8x8xf32>, vector<8x8xf32> -> vector<8x8xf32>
    %188 = vector.extract_strided_slice %171 {offsets = [8, 0], sizes = [8, 32], strides = [1, 1]} : vector<16x32xf32> to vector<8x32xf32>
    %189 = vector.extract_strided_slice %172 {offsets = [8, 0], sizes = [8, 32], strides = [1, 1]} : vector<16x32xf32> to vector<8x32xf32>
    %190 = vector.extract_strided_slice %188 {offsets = [0, 0], sizes = [8, 8], strides = [1, 1]} : vector<8x32xf32> to vector<8x8xf32>
    %191 = vector.extract_strided_slice %189 {offsets = [0, 0], sizes = [8, 8], strides = [1, 1]} : vector<8x32xf32> to vector<8x8xf32>
    %cst_86 = arith.constant dense<0.000000e+00> : vector<8x8xf32>
    %192 = tpu.matmul %190, %191, %cst_86 {dimension_numbers = #tpu.dot_dimension_numbers<[1], [1], [0], [0], [0, 0, 1, 0], [], []>} : vector<8x8xf32>, vector<8x8xf32>, vector<8x8xf32> -> vector<8x8xf32>
    %193 = vector.extract_strided_slice %188 {offsets = [0, 8], sizes = [8, 8], strides = [1, 1]} : vector<8x32xf32> to vector<8x8xf32>
    %194 = vector.extract_strided_slice %189 {offsets = [0, 8], sizes = [8, 8], strides = [1, 1]} : vector<8x32xf32> to vector<8x8xf32>
    %cst_87 = arith.constant dense<0.000000e+00> : vector<8x8xf32>
    %195 = tpu.matmul %193, %194, %cst_87 {dimension_numbers = #tpu.dot_dimension_numbers<[1], [1], [0], [0], [0, 0, 1, 0], [], []>} : vector<8x8xf32>, vector<8x8xf32>, vector<8x8xf32> -> vector<8x8xf32>
    %196 = vector.extract_strided_slice %188 {offsets = [0, 16], sizes = [8, 8], strides = [1, 1]} : vector<8x32xf32> to vector<8x8xf32>
    %197 = vector.extract_strided_slice %189 {offsets = [0, 16], sizes = [8, 8], strides = [1, 1]} : vector<8x32xf32> to vector<8x8xf32>
    %cst_88 = arith.constant dense<0.000000e+00> : vector<8x8xf32>
    %198 = tpu.matmul %196, %197, %cst_88 {dimension_numbers = #tpu.dot_dimension_numbers<[1], [1], [0], [0], [0, 0, 1, 0], [], []>} : vector<8x8xf32>, vector<8x8xf32>, vector<8x8xf32> -> vector<8x8xf32>
    %199 = vector.extract_strided_slice %188 {offsets = [0, 24], sizes = [8, 8], strides = [1, 1]} : vector<8x32xf32> to vector<8x8xf32>
    %200 = vector.extract_strided_slice %189 {offsets = [0, 24], sizes = [8, 8], strides = [1, 1]} : vector<8x32xf32> to vector<8x8xf32>
    %cst_89 = arith.constant dense<0.000000e+00> : vector<8x8xf32>
    %201 = tpu.matmul %199, %200, %cst_89 {dimension_numbers = #tpu.dot_dimension_numbers<[1], [1], [0], [0], [0, 0, 1, 0], [], []>} : vector<8x8xf32>, vector<8x8xf32>, vector<8x8xf32> -> vector<8x8xf32>
    %202 = tpu.concatenate %178, %181, %184, %187, %192, %195, %198, %201 in 0 : vector<8x8xf32>, vector<8x8xf32>, vector<8x8xf32>, vector<8x8xf32>, vector<8x8xf32>, vector<8x8xf32>, vector<8x8xf32>, vector<8x8xf32> -> vector<64x8xf32>
    %203 = arith.addf %202, %7 : vector<64x8xf32>
    %cst_90 = arith.constant dense<0xFF800000> : vector<64xf32>
    %204 = vector.multi_reduction <maximumf>, %203, %cst_90 [1] : vector<64x8xf32> to vector<64xf32>
    %205 = vector.shape_cast %204 : vector<64xf32> to vector<64x1xf32>
    %206 = vector.broadcast %205 : vector<64x1xf32> to vector<64x8xf32>
    %207 = arith.subf %203, %206 : vector<64x8xf32>
    %208 = math.exp %207 : vector<64x8xf32>
    %cst_91 = arith.constant dense<0.000000e+00> : vector<64xf32>
    %209 = vector.multi_reduction <add>, %208, %cst_91 [1] : vector<64x8xf32> to vector<64xf32>
    %210 = vector.shape_cast %209 : vector<64xf32> to vector<64x1xf32>
    %211 = tpu.reciprocal %210 {approx = true} : vector<64x1xf32> -> vector<64x1xf32>
    %212 = vector.broadcast %211 : vector<64x1xf32> to vector<64x8xf32>
    %213 = arith.mulf %208, %212 : vector<64x8xf32>
    %214 = vector.extract_strided_slice %173 {offsets = [0, 0], sizes = [8, 32], strides = [1, 1]} : vector<16x32xf32> to vector<8x32xf32>
    %215 = vector.extract_strided_slice %213 {offsets = [0, 0], sizes = [8, 8], strides = [1, 1]} : vector<64x8xf32> to vector<8x8xf32>
    %216 = vector.extract_strided_slice %214 {offsets = [0, 0], sizes = [8, 8], strides = [1, 1]} : vector<8x32xf32> to vector<8x8xf32>
    %cst_92 = arith.constant dense<0.000000e+00> : vector<8x8xf32>
    %217 = tpu.matmul %215, %216, %cst_92 {dimension_numbers = #tpu.dot_dimension_numbers<[1], [0], [0], [1], [0, 0, 1, 1], [], []>} : vector<8x8xf32>, vector<8x8xf32>, vector<8x8xf32> -> vector<8x8xf32>
    %218 = vector.extract_strided_slice %213 {offsets = [8, 0], sizes = [8, 8], strides = [1, 1]} : vector<64x8xf32> to vector<8x8xf32>
    %219 = vector.extract_strided_slice %214 {offsets = [0, 8], sizes = [8, 8], strides = [1, 1]} : vector<8x32xf32> to vector<8x8xf32>
    %cst_93 = arith.constant dense<0.000000e+00> : vector<8x8xf32>
    %220 = tpu.matmul %218, %219, %cst_93 {dimension_numbers = #tpu.dot_dimension_numbers<[1], [0], [0], [1], [0, 0, 1, 1], [], []>} : vector<8x8xf32>, vector<8x8xf32>, vector<8x8xf32> -> vector<8x8xf32>
    %221 = vector.extract_strided_slice %213 {offsets = [16, 0], sizes = [8, 8], strides = [1, 1]} : vector<64x8xf32> to vector<8x8xf32>
    %222 = vector.extract_strided_slice %214 {offsets = [0, 16], sizes = [8, 8], strides = [1, 1]} : vector<8x32xf32> to vector<8x8xf32>
    %cst_94 = arith.constant dense<0.000000e+00> : vector<8x8xf32>
    %223 = tpu.matmul %221, %222, %cst_94 {dimension_numbers = #tpu.dot_dimension_numbers<[1], [0], [0], [1], [0, 0, 1, 1], [], []>} : vector<8x8xf32>, vector<8x8xf32>, vector<8x8xf32> -> vector<8x8xf32>
    %224 = vector.extract_strided_slice %213 {offsets = [24, 0], sizes = [8, 8], strides = [1, 1]} : vector<64x8xf32> to vector<8x8xf32>
    %225 = vector.extract_strided_slice %214 {offsets = [0, 24], sizes = [8, 8], strides = [1, 1]} : vector<8x32xf32> to vector<8x8xf32>
    %cst_95 = arith.constant dense<0.000000e+00> : vector<8x8xf32>
    %226 = tpu.matmul %224, %225, %cst_95 {dimension_numbers = #tpu.dot_dimension_numbers<[1], [0], [0], [1], [0, 0, 1, 1], [], []>} : vector<8x8xf32>, vector<8x8xf32>, vector<8x8xf32> -> vector<8x8xf32>
    %227 = tpu.concatenate %217, %220, %223, %226 in 1 : vector<8x8xf32>, vector<8x8xf32>, vector<8x8xf32>, vector<8x8xf32> -> vector<8x32xf32>
    %228 = vector.extract_strided_slice %173 {offsets = [8, 0], sizes = [8, 32], strides = [1, 1]} : vector<16x32xf32> to vector<8x32xf32>
    %229 = vector.extract_strided_slice %213 {offsets = [32, 0], sizes = [8, 8], strides = [1, 1]} : vector<64x8xf32> to vector<8x8xf32>
    %230 = vector.extract_strided_slice %228 {offsets = [0, 0], sizes = [8, 8], strides = [1, 1]} : vector<8x32xf32> to vector<8x8xf32>
    %cst_96 = arith.constant dense<0.000000e+00> : vector<8x8xf32>
    %231 = tpu.matmul %229, %230, %cst_96 {dimension_numbers = #tpu.dot_dimension_numbers<[1], [0], [0], [1], [0, 0, 1, 1], [], []>} : vector<8x8xf32>, vector<8x8xf32>, vector<8x8xf32> -> vector<8x8xf32>
    %232 = vector.extract_strided_slice %213 {offsets = [40, 0], sizes = [8, 8], strides = [1, 1]} : vector<64x8xf32> to vector<8x8xf32>
    %233 = vector.extract_strided_slice %228 {offsets = [0, 8], sizes = [8, 8], strides = [1, 1]} : vector<8x32xf32> to vector<8x8xf32>
    %cst_97 = arith.constant dense<0.000000e+00> : vector<8x8xf32>
    %234 = tpu.matmul %232, %233, %cst_97 {dimension_numbers = #tpu.dot_dimension_numbers<[1], [0], [0], [1], [0, 0, 1, 1], [], []>} : vector<8x8xf32>, vector<8x8xf32>, vector<8x8xf32> -> vector<8x8xf32>
    %235 = vector.extract_strided_slice %213 {offsets = [48, 0], sizes = [8, 8], strides = [1, 1]} : vector<64x8xf32> to vector<8x8xf32>
    %236 = vector.extract_strided_slice %228 {offsets = [0, 16], sizes = [8, 8], strides = [1, 1]} : vector<8x32xf32> to vector<8x8xf32>
    %cst_98 = arith.constant dense<0.000000e+00> : vector<8x8xf32>
    %237 = tpu.matmul %235, %236, %cst_98 {dimension_numbers = #tpu.dot_dimension_numbers<[1], [0], [0], [1], [0, 0, 1, 1], [], []>} : vector<8x8xf32>, vector<8x8xf32>, vector<8x8xf32> -> vector<8x8xf32>
    %238 = vector.extract_strided_slice %213 {offsets = [56, 0], sizes = [8, 8], strides = [1, 1]} : vector<64x8xf32> to vector<8x8xf32>
    %239 = vector.extract_strided_slice %228 {offsets = [0, 24], sizes = [8, 8], strides = [1, 1]} : vector<8x32xf32> to vector<8x8xf32>
    %cst_99 = arith.constant dense<0.000000e+00> : vector<8x8xf32>
    %240 = tpu.matmul %238, %239, %cst_99 {dimension_numbers = #tpu.dot_dimension_numbers<[1], [0], [0], [1], [0, 0, 1, 1], [], []>} : vector<8x8xf32>, vector<8x8xf32>, vector<8x8xf32> -> vector<8x8xf32>
    %241 = tpu.concatenate %231, %234, %237, %240 in 1 : vector<8x8xf32>, vector<8x8xf32>, vector<8x8xf32>, vector<8x8xf32> -> vector<8x32xf32>
    %242 = tpu.concatenate %227, %241 in 0 : vector<8x32xf32>, vector<8x32xf32> -> vector<16x32xf32>
    %c1_100 = arith.constant 1 : index
    %c0_101 = arith.constant 0 : index
    %c0_102 = arith.constant 0 : index
    %243 = vector.load %arg4[%c1_100, %c0_101, %c0_102] : memref<2x32x32xf32, #tpu.memory_space<vmem>>, vector<1x32x32xf32>
    %244 = vector.shape_cast %243 : vector<1x32x32xf32> to vector<32x32xf32>
    %cst_103 = arith.constant dense<0.000000e+00> : vector<16x32xf32>
    %245 = tpu.matmul %242, %244, %cst_103 {dimension_numbers = #tpu.dot_dimension_numbers<[1], [0], [0], [1], [0, 0, 1, 1], [], []>} : vector<16x32xf32>, vector<32x32xf32>, vector<16x32xf32> -> vector<16x32xf32>
    %c1_104 = arith.constant 1 : index
    %c0_105 = arith.constant 0 : index
    %c0_106 = arith.constant 0 : index
    %246 = vector.load %arg5[%c1_104, %c0_105, %c0_106] : memref<2x1x32xf32, #tpu.memory_space<vmem>>, vector<1x1x32xf32>
    %247 = vector.shape_cast %246 : vector<1x1x32xf32> to vector<1x32xf32>
    %248 = vector.broadcast %247 : vector<1x32xf32> to vector<16x32xf32>
    %249 = arith.addf %245, %248 : vector<16x32xf32>
    %250 = arith.addf %161, %249 : vector<16x32xf32>
    %c1_107 = arith.constant 1 : index
    %c0_108 = arith.constant 0 : index
    %c0_109 = arith.constant 0 : index
    %251 = vector.load %arg10[%c1_107, %c0_108, %c0_109] : memref<2x1x32xf32, #tpu.memory_space<vmem>>, vector<1x1x32xf32>
    %252 = vector.shape_cast %251 : vector<1x1x32xf32> to vector<1x32xf32>
    %c1_110 = arith.constant 1 : index
    %c0_111 = arith.constant 0 : index
    %c0_112 = arith.constant 0 : index
    %253 = vector.load %arg11[%c1_110, %c0_111, %c0_112] : memref<2x1x32xf32, #tpu.memory_space<vmem>>, vector<1x1x32xf32>
    %254 = vector.shape_cast %253 : vector<1x1x32xf32> to vector<1x32xf32>
    %cst_113 = arith.constant dense<0.000000e+00> : vector<16xf32>
    %255 = vector.multi_reduction <add>, %250, %cst_113 [1] : vector<16x32xf32> to vector<16xf32>
    %256 = vector.shape_cast %255 : vector<16xf32> to vector<16x1xf32>
    %cst_114 = arith.constant 3.200000e+01 : f32
    %257 = vector.broadcast %cst_114 : f32 to vector<16x1xf32>
    %258 = arith.divf %256, %257 : vector<16x1xf32>
    %259 = vector.broadcast %258 : vector<16x1xf32> to vector<16x32xf32>
    %260 = arith.subf %250, %259 : vector<16x32xf32>
    %261 = arith.mulf %260, %260 : vector<16x32xf32>
    %cst_115 = arith.constant dense<0.000000e+00> : vector<16xf32>
    %262 = vector.multi_reduction <add>, %261, %cst_115 [1] : vector<16x32xf32> to vector<16xf32>
    %263 = vector.shape_cast %262 : vector<16xf32> to vector<16x1xf32>
    %cst_116 = arith.constant 3.200000e+01 : f32
    %264 = vector.broadcast %cst_116 : f32 to vector<16x1xf32>
    %265 = arith.divf %263, %264 : vector<16x1xf32>
    %cst_117 = arith.constant 9.99999974E-6 : f32
    %266 = vector.broadcast %cst_117 : f32 to vector<16x1xf32>
    %267 = arith.addf %265, %266 : vector<16x1xf32>
    %268 = math.rsqrt %267 : vector<16x1xf32>
    %269 = vector.broadcast %268 : vector<16x1xf32> to vector<16x32xf32>
    %270 = arith.mulf %260, %269 : vector<16x32xf32>
    %271 = vector.broadcast %252 : vector<1x32xf32> to vector<16x32xf32>
    %272 = arith.mulf %270, %271 : vector<16x32xf32>
    %273 = vector.broadcast %254 : vector<1x32xf32> to vector<16x32xf32>
    %274 = arith.addf %272, %273 : vector<16x32xf32>
    %c1_118 = arith.constant 1 : index
    %c0_119 = arith.constant 0 : index
    %c0_120 = arith.constant 0 : index
    %275 = vector.load %arg6[%c1_118, %c0_119, %c0_120] : memref<2x32x64xf32, #tpu.memory_space<vmem>>, vector<1x32x64xf32>
    %276 = vector.shape_cast %275 : vector<1x32x64xf32> to vector<32x64xf32>
    %cst_121 = arith.constant dense<0.000000e+00> : vector<16x64xf32>
    %277 = tpu.matmul %274, %276, %cst_121 {dimension_numbers = #tpu.dot_dimension_numbers<[1], [0], [0], [1], [0, 0, 1, 1], [], []>} : vector<16x32xf32>, vector<32x64xf32>, vector<16x64xf32> -> vector<16x64xf32>
    %c1_122 = arith.constant 1 : index
    %c0_123 = arith.constant 0 : index
    %c0_124 = arith.constant 0 : index
    %278 = vector.load %arg7[%c1_122, %c0_123, %c0_124] : memref<2x1x64xf32, #tpu.memory_space<vmem>>, vector<1x1x64xf32>
    %279 = vector.shape_cast %278 : vector<1x1x64xf32> to vector<1x64xf32>
    %280 = vector.broadcast %279 : vector<1x64xf32> to vector<16x64xf32>
    %281 = arith.addf %277, %280 : vector<16x64xf32>
    %cst_125 = arith.constant 0.000000e+00 : f32
    %282 = vector.broadcast %cst_125 : f32 to vector<16x64xf32>
    %283 = arith.maximumf %281, %282 : vector<16x64xf32>
    %c1_126 = arith.constant 1 : index
    %c0_127 = arith.constant 0 : index
    %c0_128 = arith.constant 0 : index
    %284 = vector.load %arg8[%c1_126, %c0_127, %c0_128] : memref<2x64x32xf32, #tpu.memory_space<vmem>>, vector<1x64x32xf32>
    %285 = vector.shape_cast %284 : vector<1x64x32xf32> to vector<64x32xf32>
    %cst_129 = arith.constant dense<0.000000e+00> : vector<16x32xf32>
    %286 = tpu.matmul %283, %285, %cst_129 {dimension_numbers = #tpu.dot_dimension_numbers<[1], [0], [0], [1], [0, 0, 1, 1], [], []>} : vector<16x64xf32>, vector<64x32xf32>, vector<16x32xf32> -> vector<16x32xf32>
    %c1_130 = arith.constant 1 : index
    %c0_131 = arith.constant 0 : index
    %c0_132 = arith.constant 0 : index
    %287 = vector.load %arg9[%c1_130, %c0_131, %c0_132] : memref<2x1x32xf32, #tpu.memory_space<vmem>>, vector<1x1x32xf32>
    %288 = vector.shape_cast %287 : vector<1x1x32xf32> to vector<1x32xf32>
    %289 = vector.broadcast %288 : vector<1x32xf32> to vector<16x32xf32>
    %290 = arith.addf %286, %289 : vector<16x32xf32>
    %291 = arith.addf %274, %290 : vector<16x32xf32>
    %c1_133 = arith.constant 1 : index
    %c0_134 = arith.constant 0 : index
    %c0_135 = arith.constant 0 : index
    %292 = vector.load %arg12[%c1_133, %c0_134, %c0_135] : memref<2x1x32xf32, #tpu.memory_space<vmem>>, vector<1x1x32xf32>
    %293 = vector.shape_cast %292 : vector<1x1x32xf32> to vector<1x32xf32>
    %c1_136 = arith.constant 1 : index
    %c0_137 = arith.constant 0 : index
    %c0_138 = arith.constant 0 : index
    %294 = vector.load %arg13[%c1_136, %c0_137, %c0_138] : memref<2x1x32xf32, #tpu.memory_space<vmem>>, vector<1x1x32xf32>
    %295 = vector.shape_cast %294 : vector<1x1x32xf32> to vector<1x32xf32>
    %cst_139 = arith.constant dense<0.000000e+00> : vector<16xf32>
    %296 = vector.multi_reduction <add>, %291, %cst_139 [1] : vector<16x32xf32> to vector<16xf32>
    %297 = vector.shape_cast %296 : vector<16xf32> to vector<16x1xf32>
    %cst_140 = arith.constant 3.200000e+01 : f32
    %298 = vector.broadcast %cst_140 : f32 to vector<16x1xf32>
    %299 = arith.divf %297, %298 : vector<16x1xf32>
    %300 = vector.broadcast %299 : vector<16x1xf32> to vector<16x32xf32>
    %301 = arith.subf %291, %300 : vector<16x32xf32>
    %302 = arith.mulf %301, %301 : vector<16x32xf32>
    %cst_141 = arith.constant dense<0.000000e+00> : vector<16xf32>
    %303 = vector.multi_reduction <add>, %302, %cst_141 [1] : vector<16x32xf32> to vector<16xf32>
    %304 = vector.shape_cast %303 : vector<16xf32> to vector<16x1xf32>
    %cst_142 = arith.constant 3.200000e+01 : f32
    %305 = vector.broadcast %cst_142 : f32 to vector<16x1xf32>
    %306 = arith.divf %304, %305 : vector<16x1xf32>
    %cst_143 = arith.constant 9.99999974E-6 : f32
    %307 = vector.broadcast %cst_143 : f32 to vector<16x1xf32>
    %308 = arith.addf %306, %307 : vector<16x1xf32>
    %309 = math.rsqrt %308 : vector<16x1xf32>
    %310 = vector.broadcast %309 : vector<16x1xf32> to vector<16x32xf32>
    %311 = arith.mulf %301, %310 : vector<16x32xf32>
    %312 = vector.broadcast %293 : vector<1x32xf32> to vector<16x32xf32>
    %313 = arith.mulf %311, %312 : vector<16x32xf32>
    %314 = vector.broadcast %295 : vector<1x32xf32> to vector<16x32xf32>
    %315 = arith.addf %313, %314 : vector<16x32xf32>
    %c0_144 = arith.constant 0 : index
    %c0_145 = arith.constant 0 : index
    %316 = vector.load %arg14[%c0_144, %c0_145] : memref<1x32xf32, #tpu.memory_space<vmem>>, vector<1x32xf32>
    %c0_146 = arith.constant 0 : index
    %c0_147 = arith.constant 0 : index
    %317 = vector.load %arg15[%c0_146, %c0_147] : memref<1x32xf32, #tpu.memory_space<vmem>>, vector<1x32xf32>
    %cst_148 = arith.constant dense<0.000000e+00> : vector<16xf32>
    %318 = vector.multi_reduction <add>, %315, %cst_148 [1] : vector<16x32xf32> to vector<16xf32>
    %319 = vector.shape_cast %318 : vector<16xf32> to vector<16x1xf32>
    %cst_149 = arith.constant 3.200000e+01 : f32
    %320 = vector.broadcast %cst_149 : f32 to vector<16x1xf32>
    %321 = arith.divf %319, %320 : vector<16x1xf32>
    %322 = vector.broadcast %321 : vector<16x1xf32> to vector<16x32xf32>
    %323 = arith.subf %315, %322 : vector<16x32xf32>
    %324 = arith.mulf %323, %323 : vector<16x32xf32>
    %cst_150 = arith.constant dense<0.000000e+00> : vector<16xf32>
    %325 = vector.multi_reduction <add>, %324, %cst_150 [1] : vector<16x32xf32> to vector<16xf32>
    %326 = vector.shape_cast %325 : vector<16xf32> to vector<16x1xf32>
    %cst_151 = arith.constant 3.200000e+01 : f32
    %327 = vector.broadcast %cst_151 : f32 to vector<16x1xf32>
    %328 = arith.divf %326, %327 : vector<16x1xf32>
    %cst_152 = arith.constant 9.99999974E-6 : f32
    %329 = vector.broadcast %cst_152 : f32 to vector<16x1xf32>
    %330 = arith.addf %328, %329 : vector<16x1xf32>
    %331 = math.rsqrt %330 : vector<16x1xf32>
    %332 = vector.broadcast %331 : vector<16x1xf32> to vector<16x32xf32>
    %333 = arith.mulf %323, %332 : vector<16x32xf32>
    %334 = vector.broadcast %316 : vector<1x32xf32> to vector<16x32xf32>
    %335 = arith.mulf %333, %334 : vector<16x32xf32>
    %336 = vector.broadcast %317 : vector<1x32xf32> to vector<16x32xf32>
    %337 = arith.addf %335, %336 : vector<16x32xf32>
    %c0_153 = arith.constant 0 : index
    %c0_154 = arith.constant 0 : index
    %338 = vector.load %arg16[%c0_153, %c0_154] : memref<16x32xf32, #tpu.memory_space<vmem>>, vector<16x32xf32>
    tpu.vector_store %arg16[%c0_153, %c0_154], %337 {strides = array<i32>} : memref<16x32xf32, #tpu.memory_space<vmem>>, vector<16x32xf32>,
    return
  }
}

</mosaic_0001>

<bundles_post_ra>
// kernel: transformer_encoder.1
= control target key start
LH: loop header
LB: loop body
LE: loop exit
PB: predicated region body
PF: predicated region fallthrough
CT: control target
= control target key end

     0   :  { %s5264_s0 = inlined_call_operand.hbm [shape: f32[16,32], index: 0, kind: input, shape index: {}]   ;;  %s5265_s1 = inlined_call_operand.hbm [shape: f32[8,8], index: 1, kind: input, shape index: {}]   ;;  %s5266_s2 = inlined_call_operand.vmem [shape: f32[2,32,96], index: 2, kind: input, shape index: {}]   ;;  %s5267_s3 = inlined_call_operand.vmem [shape: f32[2,1,96], index: 3, kind: input, shape index: {}]   ;;  %s5268_s4 = inlined_call_operand.vmem [shape: f32[2,32,32], index: 4, kind: input, shape index: {}]   ;;  %s5269_s5 = inlined_call_operand.vmem [shape: f32[2,1,32], index: 5, kind: input, shape index: {}]   ;;  %s5270_s6 = inlined_call_operand.vmem [shape: f32[2,32,64], index: 6, kind: input, shape index: {}]   ;;  %s5271_s7 = inlined_call_operand.vmem [shape: f32[2,1,64], index: 7, kind: input, shape index: {}]   ;;  %s5272_s8 = inlined_call_operand.vmem [shape: f32[2,64,32], index: 8, kind: input, shape index: {}]   ;;  %s5273_s9 = inlined_call_operand.vmem [shape: f32[2,1,32], index: 9, kind: input, shape index: {}]   ;;  %s5274_s10 = inlined_call_operand.vmem [shape: f32[2,1,32], index: 10, kind: input, shape index: {}]   ;;  %s5275_s11 = inlined_call_operand.vmem [shape: f32[2,1,32], index: 11, kind: input, shape index: {}]   ;;  %s5276_s12 = inlined_call_operand.vmem [shape: f32[2,1,32], index: 12, kind: input, shape index: {}]   ;;  %s5277_s13 = inlined_call_operand.vmem [shape: f32[2,1,32], index: 13, kind: input, shape index: {}]   ;;  %s5278_s14 = inlined_call_operand.vmem [shape: f32[1,32], index: 14, kind: input, shape index: {}]   ;;  %s5279_s15 = inlined_call_operand.vmem [shape: f32[1,32], index: 15, kind: input, shape index: {}]   ;;  %s5280_s16 = inlined_call_operand.hbm [shape: f32[16,32], index: 16, kind: output, shape index: {}]  }
   0x1   :  { %5298 = sst [smem:[#allocation11_spill]] %s5264_s0 }
   0x2   :  { %5299 = sst [smem:[#allocation12_spill]] %s5280_s16 }
   0x3   :  { %21 = vsyncpa [#allocation3], 0 }
   0x4   :  { %22 = vsyncpa [#allocation6], 0 }
   0x5   :  { %23 = vsyncpa [#allocation4], 0  ;;  %s4570_s21 = smov [#allocation2]   ;;  %s5300_s25 = sld [smem:[#allocation11_spill]] }
   0x6   :  { %s29_s22 = sshll.u32 %s4570_s21, 4  ;;  %s30_s22 = int_to_ptr.vmem [resolvable:$true] %s29_s22 }
   0xb   :  { %s4498_s26 = scalar_lea.hbm %s5300_s25, 256 }
   0xc   :  { %p4499_p0 = scmp.ne.s32.totalorder %s5300_s25, %s4498_s26  ;;  %p4502_p1 = scmp.lt.u32.totalorder %s4498_s26, %s5300_s25 }
   0xe   :  { %p4504_p2 = pnand %p4502_p1, %p4499_p0 }
  0x10   :  { %4507 = shalt.err (!%p4504_p2)
}
  0x11   :  { %s4508_s0 = scalar_lea.vmem %s30_s22, 256  ;;  %p4513_p4 = scmp.lt.s32.totalorder %s30_s22, %s30_s22 }
  0x12   :  { %p4509_p3 = scmp.ne.s32.totalorder %s30_s22, %s4508_s0  ;;  %p4514_p5 = scmp.lt.s32.totalorder %s4508_s0, %s4508_s0 }
  0x14   :  { %p4515_p6 = por %p4514_p5, %p4513_p4 }
  0x16   :  { %p4516_p7 = pnand %p4515_p6, %p4509_p3 }
  0x18   :  { %4519 = shalt.err (!%p4516_p7)
}
  0x19   :  { %s5283_s17 = smov 128   ;;  %s5294_s18 = smov 8  }
  0x1a   :  { %35 = dma.hbm_to_vmem [thread:$0]  %s5300_s25, 256, %s30_s22, [#allocation3], %s5283_s17, %s5283_s17, %s5294_s18  }
  0x1b   :  { %s4573_s21 = smov [#allocation5]   ;;  %s4520_s27 = scalar_lea.hbm %s5265_s1, 128 }
  0x1c   :  { %s42_s23 = sshll.u32 %s4573_s21, 4  ;;  %p4521_p8 = scmp.ne.s32.totalorder %s5265_s1, %s4520_s27  ;;  %s43_s23 = int_to_ptr.vmem [resolvable:$true] %s42_s23 }
  0x1d   :  { %p4524_p9 = scmp.lt.u32.totalorder %s4520_s27, %s5265_s1 }
  0x1f   :  { %p4526_p10 = pnand %p4524_p9, %p4521_p8 }
  0x21   :  { %4529 = shalt.err (!%p4526_p10)
}
  0x22   :  { %s4530_s16 = scalar_lea.vmem %s43_s23, 128  ;;  %p4535_p12 = scmp.lt.s32.totalorder %s43_s23, %s43_s23 }
  0x23   :  { %p4531_p11 = scmp.ne.s32.totalorder %s43_s23, %s4530_s16  ;;  %p4536_p13 = scmp.lt.s32.totalorder %s4530_s16, %s4530_s16 }
  0x25   :  { %p4537_p0 = por %p4536_p13, %p4535_p12 }
  0x27   :  { %p4538_p1 = pnand %p4537_p0, %p4531_p11 }
  0x29   :  { %4541 = shalt.err (!%p4538_p1)
}
  0x2a   :  { %45 = dma.hbm_to_vmem [thread:$0]  %s5265_s1, 128, %s43_s23, [#allocation6]  }
  0x2b   :  { %4564 = dma.done.wait [#allocation3], 256  }
  0x2c   :  { %4565 = vsyncadd [#allocation3], 4294967040 }
  0x2d   :  { %4566 = dma.done.wait [#allocation6], 128  }
  0x2e   :  { %4567 = vsyncadd [#allocation6], 4294967168  ;;  %vm96_vm0 = vcmask 261120   ;;  %v85_v0 = vld [vmem:[%s5266_s2] sm:$0xff]  ;;  %v86_v1 = vld [vmem:[%s5266_s2 + $0x8] sm:$0xff]  ;;  %v4574_v8 = vmov 0.0  }
  0x2f   :  { %v87_v2 = vld [vmem:[%s5266_s2 + $0x10] sm:$0xff]  ;;  %v4313_v3 = vpack.c.bf16 %v86_v1, %v85_v0  ;;  %v88_v4 = vld [vmem:[%s5266_s2 + $0x18] sm:$0xff]  ;;  %v4715_v5 = vld [vmem:[#allocation2] sm:$0xff]  ;;  %4070 = vmatprep.subr.mxu0 %v4574_v8  ;;  %vm4575_vm1 = vmmov 0   ;;  %s4576_s29 = smov 88   ;;  %s4577_s30 = smov 96  }
  0x30   :  { %v4317_v6 = vpack.c.bf16 %v88_v4, %v87_v2  ;;  %4057 = vmatprep.mubr.msk.f32.mxu1 %vm96_vm0, %v4715_v5  ;;  %v4719_v7 = vld [vmem:[#allocation2 + $0x8] sm:$0xff]  ;;  %4072 = vmatprep.mubr.msk.f32.mxu0 %vm4575_vm1, %v4574_v8  ;;  %v3819_v9 = vld [vmem:[%s5267_s3] ss:$0 sm:$0xff]  ;;  %s4578_s0 = smov 80   ;;  %s4579_s22 = smov 120   ;;  %vm183_vm2 = vcmask 64512  }
  0x31   :  { %4314 = vmatprep.subr.bf16.mxu1 %v4313_v3  ;;  %s4580_s25 = smov 72   ;;  %s4581_s19 = smov 112   ;;  %v82_v30 = vld [vmem:[#allocation5] sm:$0xff]  ;;  %v4583_v31 = vmov -1e+09   ;;  %vm1218_vm4 = vcmask 130048  }
  0x32   :  { %4316 = vmatpush3.bf16.msra.mxu1 %v4313_v3  ;;  %s4582_s20 = smov 104   ;;  %vm83_vm3 = vcmp.gt.f32.partialorder %v82_v30, 0.0  ;;  %s5296_s21 = smov 64   ;;  %vm1220_vm5 = vcmask 195584   ;;  %vm1789_vm6 = vcmask 523264  }
  0x33   :  { %4318 = vmatprep.subr.bf16.mxu1 %v4317_v6  ;;  %v4800_v32 = vsel %vm83_vm3, 0.0, %v4583_v31  ;;  %s5288_s24 = smov 48   ;;  %s5284_s16 = smov 56  }
  0x34   :  { %s5286_s26 = smov 40   ;;  %s5292_s27 = smov 16  }
  0x35   :  { %s5290_s17 = smov 24  }
  0x36   :  { %4320 = vmatpush3.bf16.msra.mxu1 %v4317_v6 }
  0x37   :  { %4060 = vmatprep.subr.mxu1 %v4574_v8 }
  0x39   :  { %4058 = vmatmul.mubr.msk.f32.vlgmr.msra.gmra.mrb[0].mxu1 %vm96_vm0, %v4719_v7 }
  0x3a   :  { %4062 = vmatprep.mubr.msk.f32.mxu1 %vm4575_vm1, %v4574_v8 }
 0x10c   :  { %v4059_v10 = vpop.f32.mrb[0].mxu1 }
 0x10d   :  { %v4732_v11 = vadd.f32 %v4059_v10, %v3819_v9  ;;  %v169_v12 = vpop.f32.mrb[1].mxu1 }
 0x10e   :  { %v4738_v13 = vadd.f32 %v3819_v9, %v169_v12 }
 0x10f   :  { %573 = vrot.lane.b32.xlu0 %v4732_v11, %s4576_s29  ;;  %494 = vrot.lane.b32.xlu1 %v4732_v11, %s4577_s30  ;;  %v179_v15 = vmul.f32 0.35355338, %v4732_v11 }
 0x110   :  { %v178_v14 = vmul.f32 0.35355338, %v4738_v13 }
 0x113   :  { %339 = vrot.lane.b32.xlu1 %v4738_v13, %s4578_s0  ;;  %181 = vrot.lane.b32.xlu0 %v4738_v13, %s4577_s30 }
 0x117   :  { %261 = vrot.lane.b32.xlu0 %v4738_v13, %s4576_s29  ;;  %259 = vrot.lane.b32.xlu1 %v178_v14, %s4579_s22 }
 0x11b   :  { %417 = vrot.lane.b32.xlu0 %v4738_v13, %s4580_s25  ;;  %337 = vrot.lane.b32.xlu1 %v178_v14, %s4581_s19 }
 0x11f   :  { %415 = vrot.lane.b32.xlu0 %v178_v14, %s4582_s20  ;;  %571 = vrot.lane.b32.xlu1 %v179_v15, %s4579_s22 }
 0x123   :  { %651 = vrot.lane.b32.xlu0 %v4732_v11, %s4578_s0  ;;  %729 = vrot.lane.b32.xlu1 %v4732_v11, %s4580_s25 }
 0x127   :  { %649 = vrot.lane.b32.xlu0 %v179_v15, %s4581_s19  ;;  %727 = vrot.lane.b32.xlu1 %v179_v15, %s4582_s20 }
 0x181   :  { %v574_v16 = vpop.permute.xlu0 %573  ;;  %v495_v17 = vpop.permute.xlu1 %494 }
 0x185   :  { %v340_v18 = vpop.permute.xlu1 %339  ;;  %v182_v19 = vpop.permute.xlu0 %181 }
 0x186   :  { %4061 = vmatpush3.xpose.msk.msra.mxu1 %vm183_vm2, %v182_v19  ;;  %4071 = vmatpush3.xpose.msk.msra.mxu0 %vm183_vm2, %v340_v18 }
 0x187   :  { %4065 = vmatprep.subr.mxu1 %v4574_v8  ;;  %4080 = vmatprep.subr.mxu0 %v4574_v8 }
 0x189   :  { %v262_v20 = vpop.permute.xlu0 %261  ;;  %v260_v21 = vpop.permute.xlu1 %259  ;;  %4063 = vmatmul.mubr.msk.f32.vlgmr.msra.gmra.mrb[2].mxu1 %vm183_vm2, %v178_v14 }
 0x18a   :  { %4066 = vmatpush3.xpose.msk.msra.mxu1 %vm183_vm2, %v262_v20  ;;  %4067 = vmatprep.mubr.msk.f32.mxu1 %vm4575_vm1, %v4574_v8 }
 0x18b   :  { %4075 = vmatprep.subr.mxu1 %v4574_v8 }
 0x18d   :  { %v418_v22 = vpop.permute.xlu0 %417  ;;  %v338_v23 = vpop.permute.xlu1 %337  ;;  %4068 = vmatmul.mubr.msk.f32.vlgmr.msra.gmra.mrb[4].mxu1 %vm183_vm2, %v260_v21 }
 0x18e   :  { %4073 = vmatmul.mubr.msk.f32.vlgmr.msra.gmra.mrb[0].mxu0 %vm183_vm2, %v338_v23  ;;  %4076 = vmatpush3.xpose.msk.msra.mxu1 %vm183_vm2, %v418_v22 }
 0x18f   :  { %4081 = vmatpush3.xpose.msk.msra.mxu0 %vm183_vm2, %v495_v17  ;;  %4082 = vmatprep.mubr.msk.f32.mxu0 %vm4575_vm1, %v4574_v8 }
 0x190   :  { %4077 = vmatprep.mubr.msk.f32.mxu1 %vm4575_vm1, %v4574_v8  ;;  %4085 = vmatprep.subr.mxu1 %v4574_v8 }
 0x191   :  { %v416_v24 = vpop.permute.xlu0 %415  ;;  %v572_v25 = vpop.permute.xlu1 %571  ;;  %4090 = vmatprep.subr.mxu0 %v4574_v8 }
 0x192   :  { %4078 = vmatmul.mubr.msk.f32.vlgmr.msra.gmra.mrb[6].mxu1 %vm183_vm2, %v416_v24  ;;  %4083 = vmatmul.mubr.msk.f32.vlgmr.msra.gmra.mrb[2].mxu0 %vm183_vm2, %v179_v15 }
 0x193   :  { %4086 = vmatpush3.xpose.msk.msra.mxu1 %vm183_vm2, %v574_v16  ;;  %4087 = vmatprep.mubr.msk.f32.mxu1 %vm4575_vm1, %v4574_v8 }
 0x194   :  { %4095 = vmatprep.subr.mxu1 %v4574_v8  ;;  %4092 = vmatprep.mubr.msk.f32.mxu0 %vm4575_vm1, %v4574_v8 }
 0x195   :  { %v652_v26 = vpop.permute.xlu0 %651  ;;  %v730_v27 = vpop.permute.xlu1 %729 }
 0x196   :  { %4088 = vmatmul.mubr.msk.f32.vlgmr.msra.gmra.mrb[8].mxu1 %vm183_vm2, %v572_v25  ;;  %4091 = vmatpush3.xpose.msk.msra.mxu0 %vm183_vm2, %v652_v26 }
 0x197   :  { %4096 = vmatpush3.xpose.msk.msra.mxu1 %vm183_vm2, %v730_v27  ;;  %4097 = vmatprep.mubr.msk.f32.mxu1 %vm4575_vm1, %v4574_v8 }
 0x198   :  { %4100 = vmatprep.subr.mxu0 %v4574_v8  ;;  %4105 = vmatprep.subr.mxu1 %v4574_v8 }
 0x199   :  { %v650_v28 = vpop.permute.xlu0 %649  ;;  %v728_v29 = vpop.permute.xlu1 %727 }
 0x19a   :  { %4093 = vmatmul.mubr.msk.f32.vlgmr.msra.gmra.mrb[4].mxu0 %vm183_vm2, %v650_v28  ;;  %4098 = vmatmul.mubr.msk.f32.vlgmr.msra.gmra.mrb[10].mxu1 %vm183_vm2, %v728_v29 }
 0x19b   :  { %4102 = vmatprep.mubr.msk.f32.mxu0 %vm4575_vm1, %v4574_v8  ;;  %4107 = vmatprep.mubr.msk.f32.mxu1 %vm4575_vm1, %v4574_v8 }
 0x25c   :  { %v255_v33 = vpop.f32.mrb[2].mxu1 }
 0x25d   :  { %v805_v34 = vadd.f32 %v255_v33, %v4800_v32  ;;  %v4064_v35 = vpop.f32.mrb[3].mxu1 }
 0x25f   :  { %v813_v36 = vsel %vm183_vm2, %v805_v34, -inf }
 0x260   :  { %814 = vmax.xlane.f32.xlu0 %v813_v36  ;;  %v333_v37 = vpop.f32.mrb[4].mxu1 }
 0x261   :  { %v806_v38 = vadd.f32 %v333_v37, %v4800_v32  ;;  %v4069_v39 = vpop.f32.mrb[5].mxu1  ;;  %v411_v40 = vpop.f32.mrb[0].mxu0 }
 0x262   :  { %v807_v41 = vadd.f32 %v411_v40, %v4800_v32  ;;  %v4074_v42 = vpop.f32.mrb[1].mxu0 }
 0x263   :  { %v816_v43 = vsel %vm183_vm2, %v806_v38, -inf }
 0x264   :  { %817 = vmax.xlane.f32.xlu1 %v816_v43  ;;  %v819_v44 = vsel %vm183_vm2, %v807_v41, -inf }
 0x265   :  { %v567_v45 = vpop.f32.mrb[2].mxu0  ;;  %820 = vmax.xlane.f32.xlu0 %v819_v44  ;;  %v489_v46 = vpop.f32.mrb[6].mxu1 }
 0x266   :  { %v809_v47 = vadd.f32 %v567_v45, %v4800_v32  ;;  %v808_v48 = vadd.f32 %v489_v46, %v4800_v32  ;;  %v4079_v49 = vpop.f32.mrb[7].mxu1  ;;  %v4084_v50 = vpop.f32.mrb[3].mxu0 }
 0x268   :  { %v825_v51 = vsel %vm183_vm2, %v809_v47, -inf  ;;  %v822_v52 = vsel %vm183_vm2, %v808_v48, -inf }
 0x269   :  { %826 = vmax.xlane.f32.xlu1 %v825_v51  ;;  %823 = vmax.xlane.f32.xlu0 %v822_v52  ;;  %v645_v53 = vpop.f32.mrb[8].mxu1 }
 0x26a   :  { %v810_v54 = vadd.f32 %v645_v53, %v4800_v32  ;;  %v4089_v55 = vpop.f32.mrb[9].mxu1 }
 0x26c   :  { %v828_v56 = vsel %vm183_vm2, %v810_v54, -inf }
 0x26d   :  { %v723_v57 = vpop.f32.mrb[4].mxu0  ;;  %829 = vmax.xlane.f32.xlu0 %v828_v56  ;;  %v801_v58 = vpop.f32.mrb[10].mxu1 }
 0x26e   :  { %v811_v59 = vadd.f32 %v723_v57, %v4800_v32  ;;  %v812_v60 = vadd.f32 %v801_v58, %v4800_v32  ;;  %v4094_v61 = vpop.f32.mrb[5].mxu0  ;;  %v4099_v62 = vpop.f32.mrb[11].mxu1 }
 0x270   :  { %v831_v63 = vsel %vm183_vm2, %v811_v59, -inf  ;;  %v834_v0 = vsel %vm183_vm2, %v812_v60, -inf }
 0x271   :  { %832 = vmax.xlane.f32.xlu1 %v831_v63  ;;  %835 = vmax.xlane.f32.xlu0 %v834_v0 }
 0x282   :  { %901 = vrot.lane.b32.xlu1 %v4738_v13, %s5296_s21 }
 0x286   :  { %1053 = vrot.lane.b32.xlu1 %v4738_v13, %s5288_s24 }
 0x287   :  { %977 = vrot.lane.b32.xlu0 %v4738_v13, %s5284_s16 }
 0x28a   :  { %1129 = vrot.lane.b32.xlu1 %v4738_v13, %s5286_s26 }
 0x28b   :  { %1222 = vrot.lane.b32.xlu0 %v4732_v11, %s5296_s21  ;;  %s5307_s21 = smov 24  }
 0x28e   :  { %1298 = vrot.lane.b32.xlu1 %v4732_v11, %s5284_s16  ;;  %s5305_s16 = smov 8  }
 0x2ed   :  { %v815_v1 = vpop.xlane.xlu0 %814 }
 0x2ee   :  { %v837_v2 = vsub.f32 %v805_v34, %v815_v1 }
 0x2f0   :  { %v845_v3 = vmul.f32 1.442695, %v837_v2 }
 0x2f1   :  { %v818_v4 = vpop.xlane.xlu1 %817 }
 0x2f2   :  { %4414 = vpow2.f32 %v845_v3  ;;  %v838_v6 = vsub.f32 %v806_v38, %v818_v4  ;;  %v821_v9 = vpop.xlane.xlu0 %820 }
 0x2f3   :  { %v839_v10 = vsub.f32 %v807_v41, %v821_v9 }
 0x2f4   :  { %v847_v12 = vmul.f32 1.442695, %v838_v6 }
 0x2f5   :  { %v849_v14 = vmul.f32 1.442695, %v839_v10 }
 0x2f6   :  { %4416 = vpow2.f32 %v847_v12  ;;  %v827_v15 = vpop.xlane.xlu1 %826  ;;  %v824_v16 = vpop.xlane.xlu0 %823 }
 0x2f7   :  { %4418 = vpow2.f32 %v849_v14  ;;  %v841_v13 = vsub.f32 %v809_v47, %v827_v15  ;;  %v840_v17 = vsub.f32 %v808_v48, %v824_v16 }
 0x2f9   :  { %v853_v18 = vmul.f32 1.442695, %v841_v13  ;;  %v851_v19 = vmul.f32 1.442695, %v840_v17  ;;  %v1541_v17 = vld [vmem:[%s5268_s4] sm:$0xff] }
 0x2fa   :  { %v830_v20 = vpop.xlane.xlu0 %829 }
 0x2fb   :  { %4420 = vpow2.f32 %v853_v18  ;;  %v842_v21 = vsub.f32 %v810_v54, %v830_v20  ;;  %v1542_v18 = vld [vmem:[%s5268_s4 + $0x8] sm:$0xff] }
 0x2fc   :  { %v4415_v22 = vpop.eup %4414  ;;  %4422 = vpow2.f32 %v851_v19  ;;  %v4321_v19 = vpack.c.bf16 %v1542_v18, %v1541_v17  ;;  %v1777_v18 = vld [vmem:[%s5272_s8 + $0x18] sm:$0xff] }
 0x2fd   :  { %v855_v23 = vmul.f32 1.442695, %v842_v21  ;;  %v861_v24 = vsel %vm183_vm2, %v4415_v22, 0.0 }
 0x2fe   :  { %862 = vadd.xlane.f32.xlu1 %v861_v24  ;;  %v833_v25 = vpop.xlane.xlu1 %832  ;;  %v836_v26 = vpop.xlane.xlu0 %835 }
 0x2ff   :  { %4424 = vpow2.f32 %v855_v23  ;;  %v843_v27 = vsub.f32 %v811_v59, %v833_v25  ;;  %v844_v28 = vsub.f32 %v812_v60, %v836_v26  ;;  %v1544_v23 = vld [vmem:[%s5268_s4 + $0x18] sm:$0xff] }
 0x300   :  { %v4417_v29 = vpop.eup %4416 }
 0x301   :  { %v4419_v30 = vpop.eup %4418  ;;  %v857_v31 = vmul.f32 1.442695, %v843_v27  ;;  %v859_v33 = vmul.f32 1.442695, %v844_v28  ;;  %v864_v34 = vsel %vm183_vm2, %v4417_v29, 0.0 }
 0x302   :  { %v902_v35 = vpop.permute.xlu1 %901  ;;  %865 = vadd.xlane.f32.xlu0 %v864_v34  ;;  %v978_v36 = vpop.permute.xlu0 %977  ;;  %v867_v37 = vsel %vm183_vm2, %v4419_v30, 0.0 }
 0x303   :  { %4426 = vpow2.f32 %v857_v31  ;;  %868 = vadd.xlane.f32.xlu1 %v867_v37  ;;  %4101 = vmatpush3.msra.mxu0 %v902_v35 }
 0x304   :  { %4428 = vpow2.f32 %v859_v33  ;;  %4106 = vmatpush3.msra.mxu1 %v978_v36  ;;  %4110 = vmatprep.subr.mxu0 %v4574_v8 }
 0x305   :  { %v4421_v38 = vpop.eup %4420  ;;  %4115 = vmatprep.subr.mxu1 %v4574_v8 }
 0x306   :  { %v4423_v39 = vpop.eup %4422  ;;  %v873_v40 = vsel %vm183_vm2, %v4421_v38, 0.0  ;;  %v1054_v48 = vpop.permute.xlu1 %1053 }
 0x307   :  { %874 = vadd.xlane.f32.xlu1 %v873_v40  ;;  %v870_v41 = vsel %vm183_vm2, %v4423_v39, 0.0  ;;  %v1223_v51 = vpop.permute.xlu0 %1222 }
 0x308   :  { %871 = vadd.xlane.f32.xlu0 %v870_v41 }
 0x309   :  { %v4425_v42 = vpop.eup %4424 }
 0x30a   :  { %v876_v43 = vsel %vm183_vm2, %v4425_v42, 0.0  ;;  %v1130_v49 = vpop.permute.xlu1 %1129 }
 0x30c   :  { %877 = vadd.xlane.f32.xlu0 %v876_v43 }
 0x30d   :  { %v4838_v44 = vpop.eup %4426 }
 0x30e   :  { %v4840_v45 = vpop.eup %4428  ;;  %v879_v46 = vsel %vm183_vm2, %v4838_v44, 0.0  ;;  %v1299_v50 = vpop.permute.xlu1 %1298 }
 0x30f   :  { %880 = vadd.xlane.f32.xlu1 %v879_v46  ;;  %v882_v47 = vsel %vm183_vm2, %v4840_v45, 0.0 }
 0x310   :  { %883 = vadd.xlane.f32.xlu0 %v882_v47 }
 0x320   :  { %1450 = vrot.lane.b32.xlu1 %v4732_v11, %s5286_s26 }
 0x326   :  { %1374 = vrot.lane.b32.xlu0 %v4732_v11, %s5288_s24 }
 0x38b   :  { %v863_v52 = vpop.xlane.xlu1 %862 }
 0x38c   :  { %4430 = vrcp.f32 %v863_v52  ;;  %v3846_v52 = vld [vmem:[%s5269_s5] ss:$0 sm:$0xff] }
 0x38f   :  { %v866_v53 = vpop.xlane.xlu0 %865 }
 0x390   :  { %4432 = vrcp.f32 %v866_v53  ;;  %v869_v54 = vpop.xlane.xlu1 %868 }
 0x391   :  { %4434 = vrcp.f32 %v869_v54 }
 0x394   :  { %v875_v55 = vpop.xlane.xlu1 %874 }
 0x395   :  { %4436 = vrcp.f32 %v875_v55  ;;  %v872_v56 = vpop.xlane.xlu0 %871 }
 0x396   :  { %v4431_v57 = vpop.eup %4430  ;;  %4438 = vrcp.f32 %v872_v56 }
 0x397   :  { %v893_v58 = vmul.f32 %v4431_v57, %v4415_v22  ;;  %v1543_v22 = vld [vmem:[%s5268_s4 + $0x10] sm:$0xff] }
 0x398   :  { %v4325_v24 = vpack.c.bf16 %v1544_v23, %v1543_v22 }
 0x399   :  { %v878_v59 = vpop.xlane.xlu0 %877  ;;  %4103 = vmatmul.mubr.msk.f32.vlgmr.msra.gmra.mrb[6].mxu0 %vm183_vm2, %v893_v58 }
 0x39a   :  { %v4433_v11 = vpop.eup %4432  ;;  %4440 = vrcp.f32 %v878_v59  ;;  %4111 = vmatpush3.msra.mxu0 %v1054_v48  ;;  %4112 = vmatprep.mubr.msk.f32.mxu0 %vm4575_vm1, %v4574_v8 }
 0x39b   :  { %v4435_v60 = vpop.eup %4434  ;;  %v894_v61 = vmul.f32 %v4433_v11, %v4417_v29  ;;  %4120 = vmatprep.subr.mxu0 %v4574_v8 }
 0x39c   :  { %v895_v62 = vmul.f32 %v4435_v60, %v4419_v30  ;;  %v881_v63 = vpop.xlane.xlu1 %880 }
 0x39d   :  { %4442 = vrcp.f32 %v881_v63  ;;  %v884_v0 = vpop.xlane.xlu0 %883  ;;  %4108 = vmatmul.mubr.msk.f32.vlgmr.msra.gmra.mrb[12].mxu1 %vm183_vm2, %v894_v61 }
 0x39e   :  { %4444 = vrcp.f32 %v884_v0  ;;  %4116 = vmatpush3.msra.mxu1 %v1130_v49  ;;  %4113 = vmatmul.mubr.msk.f32.vlgmr.msra.gmra.mrb[8].mxu0 %vm183_vm2, %v895_v62 }
 0x39f   :  { %v4437_v1 = vpop.eup %4436  ;;  %4121 = vmatpush3.msra.mxu0 %v1223_v51  ;;  %4117 = vmatprep.mubr.msk.f32.mxu1 %vm4575_vm1, %v4574_v8 }
 0x3a0   :  { %v4439_v2 = vpop.eup %4438  ;;  %v897_v3 = vmul.f32 %v4437_v1, %v4421_v38  ;;  %4122 = vmatprep.mubr.msk.f32.mxu0 %vm4575_vm1, %v4574_v8  ;;  %4125 = vmatprep.subr.mxu1 %v4574_v8  ;;  %v1451_v14 = vpop.permute.xlu1 %1450 }
 0x3a1   :  { %v896_v4 = vmul.f32 %v4439_v2, %v4423_v39  ;;  %v1375_v6 = vpop.permute.xlu0 %1374  ;;  %4130 = vmatprep.subr.mxu0 %v4574_v8 }
 0x3a2   :  { %4123 = vmatmul.mubr.msk.f32.vlgmr.msra.gmra.mrb[10].mxu0 %vm183_vm2, %v897_v3 }
 0x3a3   :  { %4118 = vmatmul.mubr.msk.f32.vlgmr.msra.gmra.mrb[14].mxu1 %vm183_vm2, %v896_v4  ;;  %4131 = vmatpush3.msra.mxu0 %v1375_v6  ;;  %v1681_v6 = vld [vmem:[%s5270_s6 + $0x8] sm:$0xff] }
 0x3a4   :  { %v4441_v9 = vpop.eup %4440  ;;  %4126 = vmatpush3.msra.mxu1 %v1299_v50  ;;  %4127 = vmatprep.mubr.msk.f32.mxu1 %vm4575_vm1, %v4574_v8 }
 0x3a5   :  { %v898_v10 = vmul.f32 %v4441_v9, %v4425_v42  ;;  %4135 = vmatprep.subr.mxu1 %v4574_v8  ;;  %4132 = vmatprep.mubr.msk.f32.mxu0 %vm4575_vm1, %v4574_v8 }
 0x3a6   :  { %4322 = vmatprep.subr.bf16.mxu0 %v4321_v19 }
 0x3a7   :  { %v4443_v12 = vpop.eup %4442  ;;  %4128 = vmatmul.mubr.msk.f32.vlgmr.msra.gmra.mrb[16].mxu1 %vm183_vm2, %v898_v10  ;;  %v1682_v10 = vld [vmem:[%s5270_s6 + $0x10] sm:$0xff] }
 0x3a8   :  { %v4445_v15 = vpop.eup %4444  ;;  %v899_v16 = vmul.f32 %v4443_v12, %v4838_v44  ;;  %4136 = vmatpush3.msra.mxu1 %v1451_v14  ;;  %4137 = vmatprep.mubr.msk.f32.mxu1 %vm4575_vm1, %v4574_v8  ;;  %v1683_v12 = vld [vmem:[%s5270_s6 + $0x18] sm:$0xff] }
 0x3a9   :  { %v900_v13 = vmul.f32 %v4445_v15, %v4840_v45  ;;  %v4333_v14 = vpack.c.bf16 %v1683_v12, %v1682_v10  ;;  %v1774_v15 = vld [vmem:[%s5272_s8] sm:$0xff] }
 0x3aa   :  { %4133 = vmatmul.mubr.msk.f32.vlgmr.msra.gmra.mrb[12].mxu0 %vm183_vm2, %v899_v16  ;;  %v1775_v16 = vld [vmem:[%s5272_s8 + $0x8] sm:$0xff] }
 0x3ab   :  { %4138 = vmatmul.mubr.msk.f32.vlgmr.msra.gmra.mrb[18].mxu1 %vm183_vm2, %v900_v13  ;;  %4324 = vmatpush3.bf16.msra.mxu0 %v4321_v19  ;;  %v1776_v13 = vld [vmem:[%s5272_s8 + $0x10] sm:$0xff]  ;;  %v4337_v17 = vpack.c.bf16 %v1775_v16, %v1774_v15 }
 0x3ac   :  { %4326 = vmatprep.subr.bf16.mxu0 %v4325_v24  ;;  %v4341_v19 = vpack.c.bf16 %v1777_v18, %v1776_v13 }
 0x3af   :  { %4328 = vmatpush3.bf16.msra.mxu0 %v4325_v24 }
 0x3b0   :  { %4338 = vmatprep.subr.bf16.mxu0 %v4337_v17 }
 0x46c   :  { %v973_v20 = vpop.f32.mrb[6].mxu0 }
 0x46d   :  { %v4104_v21 = vpop.f32.mrb[7].mxu0 }
 0x46e   :  { %v1779_v21 = vld [vmem:[%s5272_s8 + $0x28] sm:$0xff] }
 0x470   :  { %v1049_v25 = vpop.f32.mrb[12].mxu1 }
 0x471   :  { %v1125_v26 = vpop.f32.mrb[8].mxu0  ;;  %1206 = vrot.lane.b32.xlu0 %v1049_v25, %s5294_s18  ;;  %v4109_v27 = vpop.f32.mrb[13].mxu1 }
 0x472   :  { %1210 = vrot.lane.b32.xlu1 %v1125_v26, %s5292_s27  ;;  %v4114_v28 = vpop.f32.mrb[9].mxu0 }
 0x475   :  { %v1294_v29 = vpop.f32.mrb[10].mxu0 }
 0x476   :  { %v1201_v30 = vpop.f32.mrb[14].mxu1  ;;  %v4124_v31 = vpop.f32.mrb[11].mxu0 }
 0x477   :  { %1214 = vrot.lane.b32.xlu1 %v1201_v30, %s5290_s17  ;;  %v4119_v33 = vpop.f32.mrb[15].mxu1  ;;  %v3849_v30 = vld [vmem:[%s5274_s10] ss:$0 sm:$0xff] }
 0x478   :  { %v3850_v33 = vld [vmem:[%s5275_s11] ss:$0 sm:$0xff] }
 0x47a   :  { %v1370_v34 = vpop.f32.mrb[16].mxu1 }
 0x47b   :  { %1527 = vrot.lane.b32.xlu0 %v1370_v34, %s5294_s18  ;;  %v4129_v35 = vpop.f32.mrb[17].mxu1  ;;  %s5306_s18 = smov 16  }
 0x47d   :  { %v1446_v36 = vpop.f32.mrb[12].mxu0 }
 0x47e   :  { %v1522_v37 = vpop.f32.mrb[18].mxu1  ;;  %v4134_v38 = vpop.f32.mrb[13].mxu0 }
 0x47f   :  { %1531 = vrot.lane.b32.xlu0 %v1446_v36, %s5292_s27  ;;  %1535 = vrot.lane.b32.xlu1 %v1522_v37, %s5290_s17  ;;  %v4139_v39 = vpop.f32.mrb[19].mxu1  ;;  %s4590_s27 = smov [#allocation7]  }
 0x480   :  { %s3806_s17 = sshll.u32 %s4590_s27, 4  ;;  %s3807_s17 = int_to_ptr.vmem [resolvable:$true] %s3806_s17 }
 0x481   :  { %s4542_s26 = scalar_lea.vmem %s3807_s17, 256  ;;  %p4547_p3 = scmp.lt.s32.totalorder %s3807_s17, %s3807_s17 }
 0x482   :  { %p4543_p2 = scmp.ne.s32.totalorder %s3807_s17, %s4542_s26  ;;  %p4548_p4 = scmp.lt.s32.totalorder %s4542_s26, %s4542_s26 }
 0x484   :  { %p4549_p5 = por %p4548_p4, %p4547_p3 }
 0x486   :  { %p4550_p6 = pnand %p4549_p5, %p4543_p2 }
 0x4e3   :  { %v1207_v40 = vpop.permute.xlu0 %1206 }
 0x4e4   :  { %v1211_v41 = vpop.permute.xlu1 %1210  ;;  %v1217_v42 = vsel %vm183_vm2, %v973_v20, %v1207_v40  ;;  %v1778_v20 = vld [vmem:[%s5272_s8 + $0x20] sm:$0xff]  ;;  %v1780_v40 = vld [vmem:[%s5272_s8 + $0x30] sm:$0xff] }
 0x4e5   :  { %v1219_v43 = vsel %vm1218_vm4, %v1217_v42, %v1211_v41  ;;  %v4345_v22 = vpack.c.bf16 %v1779_v21, %v1778_v20  ;;  %v1781_v41 = vld [vmem:[%s5272_s8 + $0x38] sm:$0xff] }
 0x4e6   :  { %v4349_v42 = vpack.c.bf16 %v1781_v41, %v1780_v40 }
 0x4e9   :  { %v1215_v44 = vpop.permute.xlu1 %1214 }
 0x4ea   :  { %v1221_v45 = vsel %vm1220_vm5, %v1219_v43, %v1215_v44  ;;  %v3851_v43 = vld [vmem:[%s5271_s7] ss:$0 sm:$0xff] }
 0x4eb   :  { %4148 = vmatprep.mubr.msk.f32.mxu0 %vm96_vm0, %v1221_v45 }
 0x4ed   :  { %v1528_v46 = vpop.permute.xlu0 %1527 }
 0x4ee   :  { %v1538_v47 = vsel %vm183_vm2, %v1294_v29, %v1528_v46 }
 0x4f1   :  { %v1532_v48 = vpop.permute.xlu0 %1531  ;;  %v1536_v49 = vpop.permute.xlu1 %1535 }
 0x4f2   :  { %v1539_v50 = vsel %vm1218_vm4, %v1538_v47, %v1532_v48 }
 0x4f3   :  { %v1540_v51 = vsel %vm1220_vm5, %v1539_v50, %v1536_v49  ;;  %v3854_v50 = vld [vmem:[%s5273_s9] ss:$0 sm:$0xff] }
 0x4f4   :  { %4149 = vmatmul.mubr.msk.f32.vlgmr.msra.gmra.mrb[14].mxu0 %vm96_vm0, %v1540_v51 }
 0x4f5   :  { %4340 = vmatpush3.bf16.msra.mxu0 %v4337_v17 }
 0x4f6   :  { %4342 = vmatprep.subr.bf16.mxu0 %v4341_v19 }
 0x4f9   :  { %4344 = vmatpush3.bf16.msra.mxu0 %v4341_v19  ;;  %v3857_v19 = vld [vmem:[%s5276_s12] ss:$0 sm:$0xff] }
 0x4fa   :  { %4346 = vmatprep.subr.bf16.mxu0 %v4345_v22 }
 0x4fd   :  { %4348 = vmatpush3.bf16.msra.mxu0 %v4345_v22 }
 0x4fe   :  { %4350 = vmatprep.subr.bf16.mxu0 %v4349_v42 }
 0x501   :  { %4352 = vmatpush3.bf16.msra.mxu0 %v4349_v42 }
 0x502   :  { %4202 = vmatprep.subr.mxu0 %v4574_v8 }
 0x5c7   :  { %v4150_v53 = vpop.f32.mrb[14].mxu0 }
 0x5c8   :  { %v1630_v54 = vadd.f32 %v4150_v53, %v3846_v52  ;;  %v1624_v55 = vpop.f32.mrb[15].mxu0 }
 0x5c9   :  { %v1625_v56 = vadd.f32 %v3846_v52, %v1624_v55 }
 0x5ca   :  { %v1634_v57 = vadd.f32 %v1630_v54, %v4719_v7 }
 0x5cb   :  { %v1633_v58 = vadd.f32 %v1625_v56, %v4715_v5  ;;  %v1680_v5 = vld [vmem:[%s5270_s6] sm:$0xff] }
 0x5cc   :  { %v1640_v59 = vsel %vm96_vm0, %v1634_v57, 0.0  ;;  %v4329_v9 = vpack.c.bf16 %v1681_v6, %v1680_v5  ;;  %v3861_v6 = vld [vmem:[%s5266_s2 + $0x30] sm:$0xff] }
 0x5cd   :  { %1641 = vadd.xlane.f32.xlu1 %v1640_v59  ;;  %v1637_v11 = vsel %vm96_vm0, %v1633_v58, 0.0 }
 0x5ce   :  { %1638 = vadd.xlane.f32.xlu0 %v1637_v11  ;;  %4330 = vmatprep.subr.bf16.mxu1 %v4329_v9 }
 0x5cf   :  { %4332 = vmatpush3.bf16.msra.mxu1 %v4329_v9  ;;  %v3862_v9 = vld [vmem:[%s5266_s2 + $0x38] sm:$0xff] }
 0x5d0   :  { %4334 = vmatprep.subr.bf16.mxu1 %v4333_v14  ;;  %v4357_v10 = vpack.c.bf16 %v3862_v9, %v3861_v6 }
 0x5d3   :  { %4336 = vmatpush3.bf16.msra.mxu1 %v4333_v14 }
 0x65a   :  { %v1642_v60 = vpop.xlane.xlu1 %1641 }
 0x65b   :  { %v1645_v61 = vmul.f32 0.03125, %v1642_v60  ;;  %v1639_v62 = vpop.xlane.xlu0 %1638 }
 0x65c   :  { %v1644_v63 = vmul.f32 0.03125, %v1639_v62 }
 0x65d   :  { %v1647_v0 = vsub.f32 %v1634_v57, %v1645_v61 }
 0x65e   :  { %v1646_v1 = vsub.f32 %v1633_v58, %v1644_v63 }
 0x65f   :  { %v1649_v4 = vmul.f32 %v1647_v0, %v1647_v0 }
 0x660   :  { %v1648_v2 = vmul.f32 %v1646_v1, %v1646_v1 }
 0x661   :  { %v1653_v7 = vsel %vm96_vm0, %v1649_v4, 0.0  ;;  %v3859_v4 = vld [vmem:[%s5266_s2 + $0x20] sm:$0xff] }
 0x662   :  { %v1650_v3 = vsel %vm96_vm0, %v1648_v2, 0.0 }
 0x663   :  { %1651 = vadd.xlane.f32.xlu0 %v1650_v3 }
 0x667   :  { %1654 = vadd.xlane.f32.xlu0 %v1653_v7  ;;  %v3860_v7 = vld [vmem:[%s5266_s2 + $0x28] sm:$0xff] }
 0x668   :  { %v4353_v5 = vpack.c.bf16 %v3860_v7, %v3859_v4 }
 0x66a   :  { %4354 = vmatprep.subr.bf16.mxu1 %v4353_v5 }
 0x6f0   :  { %v1652_v23 = vpop.xlane.xlu0 %1651 }
 0x6f1   :  { %v1656_v24 = vmul.f32 0.03125, %v1652_v23  ;;  %v3858_v23 = vld [vmem:[%s5277_s13] ss:$0 sm:$0xff] }
 0x6f3   :  { %v1658_v25 = vadd.f32 1e-05, %v1656_v24 }
 0x6f4   :  { %v1655_v26 = vpop.xlane.xlu0 %1654 }
 0x6f5   :  { %4446 = vrsqrt.f32 %v1658_v25  ;;  %v1657_v27 = vmul.f32 0.03125, %v1655_v26 }
 0x6f7   :  { %v1659_v28 = vadd.f32 1e-05, %v1657_v27 }
 0x6f9   :  { %4448 = vrsqrt.f32 %v1659_v28  ;;  %v3864_v28 = vld [vmem:[%s5267_s3 + $0x1] ss:$0 sm:$0xff]  ;;  %s5301_s3 = smov 64  }
 0x6ff   :  { %v4447_v29 = vpop.eup %4446 }
 0x700   :  { %v1662_v31 = vmul.f32 %v4447_v29, %v1646_v1 }
 0x702   :  { %v1670_v34 = vmul.f32 %v3849_v30, %v1662_v31 }
 0x703   :  { %v4449_v35 = vpop.eup %4448 }
 0x704   :  { %v1663_v36 = vmul.f32 %v4449_v35, %v1647_v0  ;;  %v1678_v37 = vadd.f32 %v3850_v33, %v1670_v34 }
 0x706   :  { %v1671_v38 = vmul.f32 %v3849_v30, %v1663_v36  ;;  %4159 = vmatprep.mubr.msk.f32.mxu1 %vm96_vm0, %v1678_v37 }
 0x708   :  { %v1679_v39 = vadd.f32 %v3850_v33, %v1671_v38 }
 0x70a   :  { %4160 = vmatmul.mubr.msk.f32.vlgmr.msra.gmra.mrb[20].mxu1 %vm96_vm0, %v1679_v39 }
 0x70b   :  { %4356 = vmatpush3.bf16.msra.mxu1 %v4353_v5 }
 0x70c   :  { %4358 = vmatprep.subr.bf16.mxu1 %v4357_v10 }
 0x70f   :  { %4360 = vmatpush3.bf16.msra.mxu1 %v4357_v10 }
 0x710   :  { %4192 = vmatprep.subr.mxu1 %v4574_v8 }
 0x7dd   :  { %v4161_v44 = vpop.f32.mrb[20].mxu1 }
 0x7de   :  { %v1769_v45 = vadd.f32 %v4161_v44, %v3851_v43  ;;  %v1763_v46 = vpop.f32.mrb[21].mxu1 }
 0x7df   :  { %v1764_v47 = vadd.f32 %v3851_v43, %v1763_v46 }
 0x7e0   :  { %v1773_v49 = vmax.f32 %v1769_v45, 0.0 }
 0x7e1   :  { %v1772_v48 = vmax.f32 %v1764_v47, 0.0 }
 0x7e3   :  { %4178 = vmatprep.mubr.msk.f32.mxu0 %vm1789_vm6, %v1772_v48 }
 0x7e4   :  { %4179 = vmatmul.mubr.msk.f32.vlgmr.msra.gmra.mrb[16].mxu0 %vm1789_vm6, %v1773_v49 }
 0x7e5   :  { %4204 = vmatprep.mubr.msk.f32.mxu0 %vm4575_vm1, %v4574_v8 }
 0x8b7   :  { %v4180_v51 = vpop.f32.mrb[16].mxu0 }
 0x8b8   :  { %v1868_v52 = vadd.f32 %v4180_v51, %v3854_v50  ;;  %v1862_v53 = vpop.f32.mrb[17].mxu0 }
 0x8b9   :  { %v1863_v54 = vadd.f32 %v3854_v50, %v1862_v53 }
 0x8ba   :  { %v1872_v55 = vadd.f32 %v1868_v52, %v1679_v39 }
 0x8bb   :  { %v1871_v56 = vadd.f32 %v1863_v54, %v1678_v37 }
 0x8bc   :  { %v1878_v57 = vsel %vm96_vm0, %v1872_v55, 0.0 }
 0x8bd   :  { %1879 = vadd.xlane.f32.xlu0 %v1878_v57  ;;  %v1875_v58 = vsel %vm96_vm0, %v1871_v56, 0.0 }
 0x8be   :  { %1876 = vadd.xlane.f32.xlu1 %v1875_v58 }
 0x94a   :  { %v1880_v59 = vpop.xlane.xlu0 %1879 }
 0x94b   :  { %v1882_v11 = vmul.f32 0.03125, %v1880_v59  ;;  %v1877_v60 = vpop.xlane.xlu1 %1876 }
 0x94c   :  { %v1881_v61 = vmul.f32 0.03125, %v1877_v60 }
 0x94d   :  { %v1884_v62 = vsub.f32 %v1872_v55, %v1882_v11 }
 0x94e   :  { %v1883_v63 = vsub.f32 %v1871_v56, %v1881_v61 }
 0x94f   :  { %v1886_v0 = vmul.f32 %v1884_v62, %v1884_v62 }
 0x950   :  { %v1885_v1 = vmul.f32 %v1883_v63, %v1883_v63 }
 0x951   :  { %v1890_v2 = vsel %vm96_vm0, %v1886_v0, 0.0 }
 0x952   :  { %1891 = vadd.xlane.f32.xlu0 %v1890_v2  ;;  %v1887_v3 = vsel %vm96_vm0, %v1885_v1, 0.0 }
 0x953   :  { %1888 = vadd.xlane.f32.xlu1 %v1887_v3 }
 0x9df   :  { %v1892_v12 = vpop.xlane.xlu0 %1891 }
 0x9e0   :  { %v1894_v14 = vmul.f32 0.03125, %v1892_v12  ;;  %v1889_v15 = vpop.xlane.xlu1 %1888 }
 0x9e1   :  { %v1893_v16 = vmul.f32 0.03125, %v1889_v15 }
 0x9e2   :  { %v1896_v13 = vadd.f32 1e-05, %v1894_v14 }
 0x9e3   :  { %v1895_v17 = vadd.f32 1e-05, %v1893_v16 }
 0x9e4   :  { %4450 = vrsqrt.f32 %v1896_v13 }
 0x9e5   :  { %4452 = vrsqrt.f32 %v1895_v17 }
 0x9ee   :  { %v4451_v18 = vpop.eup %4450 }
 0x9ef   :  { %v4453_v20 = vpop.eup %4452  ;;  %v1900_v21 = vmul.f32 %v4451_v18, %v1884_v62 }
 0x9f0   :  { %v1899_v22 = vmul.f32 %v4453_v20, %v1883_v63 }
 0x9f1   :  { %v1908_v24 = vmul.f32 %v3857_v19, %v1900_v21 }
 0x9f2   :  { %v1907_v25 = vmul.f32 %v3857_v19, %v1899_v22 }
 0x9f3   :  { %v4991_v27 = vadd.f32 %v3858_v23, %v1908_v24 }
 0x9f4   :  { %v4989_v26 = vadd.f32 %v3858_v23, %v1907_v25 }
 0x9f6   :  { %4189 = vmatprep.mubr.msk.f32.mxu1 %vm96_vm0, %v4989_v26 }
 0x9f7   :  { %4190 = vmatmul.mubr.msk.f32.vlgmr.msra.gmra.mrb[22].mxu1 %vm96_vm0, %v4991_v27 }
 0x9f8   :  { %4194 = vmatprep.mubr.msk.f32.mxu1 %vm4575_vm1, %v4574_v8 }
 0xaca   :  { %v4191_v29 = vpop.f32.mrb[22].mxu1 }
 0xacb   :  { %v5002_v30 = vadd.f32 %v4191_v29, %v3864_v28  ;;  %v2002_v31 = vpop.f32.mrb[23].mxu1 }
 0xacc   :  { %v5008_v33 = vadd.f32 %v3864_v28, %v2002_v31 }
 0xacd   :  { %2405 = vrot.lane.b32.xlu0 %v5002_v30, %s4576_s29  ;;  %2326 = vrot.lane.b32.xlu1 %v5002_v30, %s4577_s30  ;;  %v2012_v35 = vmul.f32 0.35355338, %v5002_v30 }
 0xace   :  { %v2011_v34 = vmul.f32 0.35355338, %v5008_v33 }
 0xad1   :  { %2093 = vrot.lane.b32.xlu0 %v5008_v33, %s4576_s29  ;;  %2014 = vrot.lane.b32.xlu1 %v5008_v33, %s4577_s30  ;;  %s5302_s29 = smov 48   ;;  %s5303_s30 = smov 40  }
 0xad5   :  { %2249 = vrot.lane.b32.xlu0 %v5008_v33, %s4580_s25  ;;  %2171 = vrot.lane.b32.xlu1 %v5008_v33, %s4578_s0 }
 0xad9   :  { %2247 = vrot.lane.b32.xlu0 %v2011_v34, %s4582_s20  ;;  %2091 = vrot.lane.b32.xlu1 %v2011_v34, %s4579_s22 }
 0xadd   :  { %2483 = vrot.lane.b32.xlu0 %v5002_v30, %s4578_s0  ;;  %2169 = vrot.lane.b32.xlu1 %v2011_v34, %s4581_s19  ;;  %s5304_s0 = smov 56  }
 0xae1   :  { %2481 = vrot.lane.b32.xlu0 %v2012_v35, %s4581_s19  ;;  %2403 = vrot.lane.b32.xlu1 %v2012_v35, %s4579_s22 }
 0xae5   :  { %2561 = vrot.lane.b32.xlu1 %v5002_v30, %s4580_s25 }
 0xae9   :  { %2559 = vrot.lane.b32.xlu1 %v2012_v35, %s4582_s20 }
 0xb3f   :  { %v2406_v36 = vpop.permute.xlu0 %2405  ;;  %v2327_v37 = vpop.permute.xlu1 %2326 }
 0xb43   :  { %v2094_v38 = vpop.permute.xlu0 %2093  ;;  %v2015_v39 = vpop.permute.xlu1 %2014 }
 0xb44   :  { %4193 = vmatpush3.xpose.msk.msra.mxu1 %vm183_vm2, %v2015_v39 }
 0xb45   :  { %4197 = vmatprep.subr.mxu1 %v4574_v8 }
 0xb47   :  { %v2250_v40 = vpop.permute.xlu0 %2249  ;;  %v2172_v41 = vpop.permute.xlu1 %2171  ;;  %4195 = vmatmul.mubr.msk.f32.vlgmr.msra.gmra.mrb[24].mxu1 %vm183_vm2, %v2011_v34 }
 0xb48   :  { %4198 = vmatpush3.xpose.msk.msra.mxu1 %vm183_vm2, %v2094_v38  ;;  %4203 = vmatpush3.xpose.msk.msra.mxu0 %vm183_vm2, %v2172_v41 }
 0xb49   :  { %4199 = vmatprep.mubr.msk.f32.mxu1 %vm4575_vm1, %v4574_v8  ;;  %4207 = vmatprep.subr.mxu1 %v4574_v8 }
 0xb4a   :  { %4212 = vmatprep.subr.mxu0 %v4574_v8 }
 0xb4b   :  { %v2248_v42 = vpop.permute.xlu0 %2247  ;;  %v2092_v43 = vpop.permute.xlu1 %2091 }
 0xb4c   :  { %4200 = vmatmul.mubr.msk.f32.vlgmr.msra.gmra.mrb[26].mxu1 %vm183_vm2, %v2092_v43 }
 0xb4d   :  { %4208 = vmatpush3.xpose.msk.msra.mxu1 %vm183_vm2, %v2250_v40  ;;  %4209 = vmatprep.mubr.msk.f32.mxu1 %vm4575_vm1, %v4574_v8 }
 0xb4e   :  { %4217 = vmatprep.subr.mxu1 %v4574_v8 }
 0xb4f   :  { %v2170_v44 = vpop.permute.xlu1 %2169  ;;  %v2484_v45 = vpop.permute.xlu0 %2483 }
 0xb50   :  { %4205 = vmatmul.mubr.msk.f32.vlgmr.msra.gmra.mrb[18].mxu0 %vm183_vm2, %v2170_v44  ;;  %4210 = vmatmul.mubr.msk.f32.vlgmr.msra.gmra.mrb[28].mxu1 %vm183_vm2, %v2248_v42 }
 0xb51   :  { %4213 = vmatpush3.xpose.msk.msra.mxu0 %vm183_vm2, %v2327_v37  ;;  %4218 = vmatpush3.xpose.msk.msra.mxu1 %vm183_vm2, %v2406_v36 }
 0xb52   :  { %4214 = vmatprep.mubr.msk.f32.mxu0 %vm4575_vm1, %v4574_v8  ;;  %4222 = vmatprep.subr.mxu0 %v4574_v8 }
 0xb53   :  { %v2404_v46 = vpop.permute.xlu1 %2403  ;;  %4219 = vmatprep.mubr.msk.f32.mxu1 %vm4575_vm1, %v4574_v8  ;;  %4227 = vmatprep.subr.mxu1 %v4574_v8  ;;  %v2482_v47 = vpop.permute.xlu0 %2481 }
 0xb54   :  { %4215 = vmatmul.mubr.msk.f32.vlgmr.msra.gmra.mrb[20].mxu0 %vm183_vm2, %v2012_v35  ;;  %4220 = vmatmul.mubr.msk.f32.vlgmr.msra.gmra.mrb[30].mxu1 %vm183_vm2, %v2404_v46 }
 0xb55   :  { %4223 = vmatpush3.xpose.msk.msra.mxu0 %vm183_vm2, %v2484_v45  ;;  %4224 = vmatprep.mubr.msk.f32.mxu0 %vm4575_vm1, %v4574_v8 }
 0xb56   :  { %4229 = vmatprep.mubr.msk.f32.mxu1 %vm4575_vm1, %v4574_v8  ;;  %4232 = vmatprep.subr.mxu0 %v4574_v8 }
 0xb57   :  { %v2562_v48 = vpop.permute.xlu1 %2561 }
 0xb58   :  { %4225 = vmatmul.mubr.msk.f32.vlgmr.msra.gmra.mrb[22].mxu0 %vm183_vm2, %v2482_v47  ;;  %4228 = vmatpush3.xpose.msk.msra.mxu1 %vm183_vm2, %v2562_v48 }
 0xb59   :  { %4237 = vmatprep.subr.mxu1 %v4574_v8  ;;  %4234 = vmatprep.mubr.msk.f32.mxu0 %vm4575_vm1, %v4574_v8 }
 0xb5b   :  { %v2560_v49 = vpop.permute.xlu1 %2559 }
 0xb5c   :  { %4230 = vmatmul.mubr.msk.f32.vlgmr.msra.gmra.mrb[32].mxu1 %vm183_vm2, %v2560_v49 }
 0xb5d   :  { %4239 = vmatprep.mubr.msk.f32.mxu1 %vm4575_vm1, %v4574_v8 }
 0xc1a   :  { %v2087_v50 = vpop.f32.mrb[24].mxu1 }
 0xc1b   :  { %v2637_v51 = vadd.f32 %v2087_v50, %v4800_v32  ;;  %v4196_v52 = vpop.f32.mrb[25].mxu1 }
 0xc1d   :  { %v2645_v53 = vsel %vm183_vm2, %v2637_v51, -inf }
 0xc1e   :  { %2646 = vmax.xlane.f32.xlu0 %v2645_v53 }
 0xc1f   :  { %v2165_v54 = vpop.f32.mrb[26].mxu1 }
 0xc20   :  { %v2638_v55 = vadd.f32 %v2165_v54, %v4800_v32  ;;  %v4201_v56 = vpop.f32.mrb[27].mxu1 }
 0xc22   :  { %v2648_v57 = vsel %vm183_vm2, %v2638_v55, -inf }
 0xc23   :  { %v2243_v58 = vpop.f32.mrb[18].mxu0  ;;  %2649 = vmax.xlane.f32.xlu1 %v2648_v57  ;;  %v2321_v59 = vpop.f32.mrb[28].mxu1 }
 0xc24   :  { %v2639_v11 = vadd.f32 %v2243_v58, %v4800_v32  ;;  %v4206_v60 = vpop.f32.mrb[19].mxu0  ;;  %v4211_v61 = vpop.f32.mrb[29].mxu1  ;;  %v2640_v62 = vadd.f32 %v2321_v59, %v4800_v32 }
 0xc26   :  { %v2651_v63 = vsel %vm183_vm2, %v2639_v11, -inf  ;;  %v2654_v6 = vsel %vm183_vm2, %v2640_v62, -inf }
 0xc27   :  { %v2399_v0 = vpop.f32.mrb[20].mxu0  ;;  %2652 = vmax.xlane.f32.xlu0 %v2651_v63  ;;  %v2477_v1 = vpop.f32.mrb[30].mxu1 }
 0xc28   :  { %v2641_v2 = vadd.f32 %v2399_v0, %v4800_v32  ;;  %v4216_v3 = vpop.f32.mrb[21].mxu0  ;;  %v4221_v4 = vpop.f32.mrb[31].mxu1  ;;  %v2642_v7 = vadd.f32 %v2477_v1, %v4800_v32 }
 0xc2a   :  { %v2657_v5 = vsel %vm183_vm2, %v2641_v2, -inf  ;;  %v2660_v15 = vsel %vm183_vm2, %v2642_v7, -inf }
 0xc2b   :  { %v2555_v9 = vpop.f32.mrb[22].mxu0  ;;  %2658 = vmax.xlane.f32.xlu1 %v2657_v5  ;;  %2655 = vmax.xlane.f32.xlu0 %v2654_v6 }
 0xc2c   :  { %v2643_v10 = vadd.f32 %v2555_v9, %v4800_v32  ;;  %v4226_v12 = vpop.f32.mrb[23].mxu0 }
 0xc2e   :  { %v2663_v14 = vsel %vm183_vm2, %v2643_v10, -inf }
 0xc2f   :  { %2664 = vmax.xlane.f32.xlu1 %v2663_v14  ;;  %2661 = vmax.xlane.f32.xlu0 %v2660_v15  ;;  %v2633_v16 = vpop.f32.mrb[32].mxu1 }
 0xc30   :  { %v2644_v13 = vadd.f32 %v2633_v16, %v4800_v32  ;;  %v4231_v17 = vpop.f32.mrb[33].mxu1 }
 0xc32   :  { %v2666_v18 = vsel %vm183_vm2, %v2644_v13, -inf }
 0xc33   :  { %2667 = vmax.xlane.f32.xlu0 %v2666_v18 }
 0xc40   :  { %2733 = vrot.lane.b32.xlu1 %v5008_v33, %s5301_s3 }
 0xc44   :  { %2885 = vrot.lane.b32.xlu1 %v5008_v33, %s5302_s29 }
 0xc48   :  { %2961 = vrot.lane.b32.xlu1 %v5008_v33, %s5303_s30 }
 0xc49   :  { %2809 = vrot.lane.b32.xlu0 %v5008_v33, %s5304_s0 }
 0xc4c   :  { %3128 = vrot.lane.b32.xlu1 %v5002_v30, %s5304_s0 }
 0xc4d   :  { %3052 = vrot.lane.b32.xlu0 %v5002_v30, %s5301_s3 }
 0xcab   :  { %v2647_v32 = vpop.xlane.xlu0 %2646 }
 0xcac   :  { %v2669_v19 = vsub.f32 %v2637_v51, %v2647_v32 }
 0xcae   :  { %v2677_v20 = vmul.f32 1.442695, %v2669_v19 }
 0xcb0   :  { %4454 = vpow2.f32 %v2677_v20  ;;  %v2650_v21 = vpop.xlane.xlu1 %2649 }
 0xcb1   :  { %v2670_v22 = vsub.f32 %v2638_v55, %v2650_v21 }
 0xcb3   :  { %v2679_v23 = vmul.f32 1.442695, %v2670_v22 }
 0xcb4   :  { %v2653_v24 = vpop.xlane.xlu0 %2652 }
 0xcb5   :  { %4456 = vpow2.f32 %v2679_v23  ;;  %v2671_v25 = vsub.f32 %v2639_v11, %v2653_v24 }
 0xcb7   :  { %v2681_v28 = vmul.f32 1.442695, %v2671_v25 }
 0xcb8   :  { %v2659_v29 = vpop.xlane.xlu1 %2658  ;;  %v2656_v31 = vpop.xlane.xlu0 %2655 }
 0xcb9   :  { %4458 = vpow2.f32 %v2681_v28  ;;  %v2673_v33 = vsub.f32 %v2641_v2, %v2659_v29  ;;  %v2672_v34 = vsub.f32 %v2640_v62, %v2656_v31 }
 0xcba   :  { %v4455_v35 = vpop.eup %4454 }
 0xcbb   :  { %v2685_v36 = vmul.f32 1.442695, %v2673_v33  ;;  %v2683_v37 = vmul.f32 1.442695, %v2672_v34  ;;  %v2693_v38 = vsel %vm183_vm2, %v4455_v35, 0.0 }
 0xcbc   :  { %2694 = vadd.xlane.f32.xlu1 %v2693_v38  ;;  %v2665_v39 = vpop.xlane.xlu1 %2664  ;;  %v2662_v40 = vpop.xlane.xlu0 %2661 }
 0xcbd   :  { %4460 = vpow2.f32 %v2685_v36  ;;  %v2675_v41 = vsub.f32 %v2643_v10, %v2665_v39  ;;  %v2674_v42 = vsub.f32 %v2642_v7, %v2662_v40  ;;  %v3892_v36 = vld [vmem:[%s5268_s4 + $0x28] sm:$0xff]  ;;  %v3893_v39 = vld [vmem:[%s5268_s4 + $0x30] sm:$0xff]  ;;  %v3894_v40 = vld [vmem:[%s5268_s4 + $0x38] sm:$0xff] }
 0xcbe   :  { %4462 = vpow2.f32 %v2683_v37 }
 0xcbf   :  { %v4457_v43 = vpop.eup %4456  ;;  %v2689_v44 = vmul.f32 1.442695, %v2675_v41  ;;  %v2687_v45 = vmul.f32 1.442695, %v2674_v42  ;;  %v4365_v41 = vpack.c.bf16 %v3894_v40, %v3893_v39 }
 0xcc0   :  { %v2734_v46 = vpop.permute.xlu1 %2733  ;;  %v2668_v47 = vpop.xlane.xlu0 %2667  ;;  %v2696_v48 = vsel %vm183_vm2, %v4457_v43, 0.0 }
 0xcc1   :  { %4464 = vpow2.f32 %v2689_v44  ;;  %v2676_v49 = vsub.f32 %v2644_v13, %v2668_v47  ;;  %4233 = vmatpush3.msra.mxu0 %v2734_v46  ;;  %2697 = vadd.xlane.f32.xlu0 %v2696_v48 }
 0xcc2   :  { %4466 = vpow2.f32 %v2687_v45  ;;  %4242 = vmatprep.subr.mxu0 %v4574_v8 }
 0xcc3   :  { %v4459_v50 = vpop.eup %4458  ;;  %v2691_v51 = vmul.f32 1.442695, %v2676_v49 }
 0xcc4   :  { %v2810_v52 = vpop.permute.xlu0 %2809  ;;  %v2699_v53 = vsel %vm183_vm2, %v4459_v50, 0.0  ;;  %v2886_v63 = vpop.permute.xlu1 %2885 }
 0xcc5   :  { %4468 = vpow2.f32 %v2691_v51  ;;  %2700 = vadd.xlane.f32.xlu1 %v2699_v53  ;;  %4238 = vmatpush3.msra.mxu1 %v2810_v52 }
 0xcc6   :  { %4247 = vmatprep.subr.mxu1 %v4574_v8 }
 0xcc7   :  { %v4461_v54 = vpop.eup %4460 }
 0xcc8   :  { %v4463_v55 = vpop.eup %4462  ;;  %v2705_v56 = vsel %vm183_vm2, %v4461_v54, 0.0  ;;  %v2962_v0 = vpop.permute.xlu1 %2961 }
 0xcc9   :  { %2706 = vadd.xlane.f32.xlu1 %v2705_v56  ;;  %v2702_v57 = vsel %vm183_vm2, %v4463_v55, 0.0  ;;  %v3053_v3 = vpop.permute.xlu0 %3052 }
 0xcca   :  { %2703 = vadd.xlane.f32.xlu0 %v2702_v57 }
 0xccb   :  { %v4465_v58 = vpop.eup %4464 }
 0xccc   :  { %v4467_v59 = vpop.eup %4466  ;;  %v2711_v11 = vsel %vm183_vm2, %v4465_v58, 0.0  ;;  %v3129_v1 = vpop.permute.xlu1 %3128 }
 0xccd   :  { %2712 = vadd.xlane.f32.xlu1 %v2711_v11  ;;  %v2708_v60 = vsel %vm183_vm2, %v4467_v59, 0.0 }
 0xcce   :  { %2709 = vadd.xlane.f32.xlu0 %v2708_v60 }
 0xccf   :  { %v5107_v61 = vpop.eup %4468 }
 0xcd0   :  { %v2714_v62 = vsel %vm183_vm2, %v5107_v61, 0.0 }
 0xcd2   :  { %2715 = vadd.xlane.f32.xlu0 %v2714_v62 }
 0xcde   :  { %3280 = vrot.lane.b32.xlu1 %v5002_v30, %s5303_s30 }
 0xce8   :  { %3204 = vrot.lane.b32.xlu0 %v5002_v30, %s5302_s29 }
 0xd49   :  { %v2695_v2 = vpop.xlane.xlu1 %2694 }
 0xd4a   :  { %4470 = vrcp.f32 %v2695_v2 }
 0xd4e   :  { %v2698_v4 = vpop.xlane.xlu0 %2697 }
 0xd4f   :  { %4472 = vrcp.f32 %v2698_v4 }
 0xd52   :  { %v2701_v7 = vpop.xlane.xlu1 %2700 }
 0xd53   :  { %4474 = vrcp.f32 %v2701_v7 }
 0xd54   :  { %v4471_v5 = vpop.eup %4470 }
 0xd55   :  { %v2725_v6 = vmul.f32 %v4471_v5, %v4455_v35  ;;  %v3891_v35 = vld [vmem:[%s5268_s4 + $0x20] sm:$0xff] }
 0xd56   :  { %v2707_v9 = vpop.xlane.xlu1 %2706  ;;  %v4361_v37 = vpack.c.bf16 %v3892_v36, %v3891_v35  ;;  %v3916_v35 = vld [vmem:[%s5272_s8 + $0x68] sm:$0xff] }
 0xd57   :  { %4476 = vrcp.f32 %v2707_v9  ;;  %v2704_v10 = vpop.xlane.xlu0 %2703  ;;  %4235 = vmatmul.mubr.msk.f32.vlgmr.msra.gmra.mrb[24].mxu0 %vm183_vm2, %v2725_v6 }
 0xd58   :  { %4478 = vrcp.f32 %v2704_v10  ;;  %4243 = vmatpush3.msra.mxu0 %v2886_v63  ;;  %4244 = vmatprep.mubr.msk.f32.mxu0 %vm4575_vm1, %v4574_v8 }
 0xd59   :  { %v4473_v30 = vpop.eup %4472  ;;  %4252 = vmatprep.subr.mxu0 %v4574_v8 }
 0xd5a   :  { %v2726_v12 = vmul.f32 %v4473_v30, %v4457_v43  ;;  %v2713_v14 = vpop.xlane.xlu1 %2712 }
 0xd5b   :  { %4480 = vrcp.f32 %v2713_v14  ;;  %v2710_v15 = vpop.xlane.xlu0 %2709 }
 0xd5c   :  { %4482 = vrcp.f32 %v2710_v15  ;;  %4240 = vmatmul.mubr.msk.f32.vlgmr.msra.gmra.mrb[34].mxu1 %vm183_vm2, %v2726_v12 }
 0xd5d   :  { %v4475_v16 = vpop.eup %4474  ;;  %4248 = vmatpush3.msra.mxu1 %v2962_v0  ;;  %4249 = vmatprep.mubr.msk.f32.mxu1 %vm4575_vm1, %v4574_v8 }
 0xd5e   :  { %v2727_v13 = vmul.f32 %v4475_v16, %v4459_v50  ;;  %4257 = vmatprep.subr.mxu1 %v4574_v8  ;;  %v3281_v28 = vpop.permute.xlu1 %3280 }
 0xd5f   :  { %v2716_v17 = vpop.xlane.xlu0 %2715 }
 0xd60   :  { %4484 = vrcp.f32 %v2716_v17  ;;  %4245 = vmatmul.mubr.msk.f32.vlgmr.msra.gmra.mrb[26].mxu0 %vm183_vm2, %v2727_v13 }
 0xd61   :  { %v4477_v18 = vpop.eup %4476  ;;  %4253 = vmatpush3.msra.mxu0 %v3053_v3  ;;  %4254 = vmatprep.mubr.msk.f32.mxu0 %vm4575_vm1, %v4574_v8 }
 0xd62   :  { %v4479_v32 = vpop.eup %4478  ;;  %v2729_v19 = vmul.f32 %v4477_v18, %v4461_v54  ;;  %4262 = vmatprep.subr.mxu0 %v4574_v8 }
 0xd63   :  { %v2728_v20 = vmul.f32 %v4479_v32, %v4463_v55  ;;  %v3205_v21 = vpop.permute.xlu0 %3204 }
 0xd64   :  { %4255 = vmatmul.mubr.msk.f32.vlgmr.msra.gmra.mrb[28].mxu0 %vm183_vm2, %v2729_v19  ;;  %v3904_v19 = vld [vmem:[%s5270_s6 + $0x28] sm:$0xff] }
 0xd65   :  { %v4481_v22 = vpop.eup %4480  ;;  %4250 = vmatmul.mubr.msk.f32.vlgmr.msra.gmra.mrb[36].mxu1 %vm183_vm2, %v2728_v20  ;;  %4263 = vmatpush3.msra.mxu0 %v3205_v21  ;;  %v3905_v21 = vld [vmem:[%s5270_s6 + $0x30] sm:$0xff] }
 0xd66   :  { %v4483_v23 = vpop.eup %4482  ;;  %v2731_v24 = vmul.f32 %v4481_v22, %v4465_v58  ;;  %4258 = vmatpush3.msra.mxu1 %v3129_v1  ;;  %4259 = vmatprep.mubr.msk.f32.mxu1 %vm4575_vm1, %v4574_v8  ;;  %v3896_v1 = vld [vmem:[%s5269_s5 + $0x1] ss:$0 sm:$0xff]  ;;  %v3906_v22 = vld [vmem:[%s5270_s6 + $0x38] sm:$0xff] }
 0xd67   :  { %v2730_v25 = vmul.f32 %v4483_v23, %v4467_v59  ;;  %4264 = vmatprep.mubr.msk.f32.mxu0 %vm4575_vm1, %v4574_v8  ;;  %4267 = vmatprep.subr.mxu1 %v4574_v8  ;;  %v4373_v23 = vpack.c.bf16 %v3906_v22, %v3905_v21  ;;  %v3925_v21 = vld [vmem:[%s5276_s12 + $0x1] ss:$0 sm:$0xff] }
 0xd68   :  { %4265 = vmatmul.mubr.msk.f32.vlgmr.msra.gmra.mrb[30].mxu0 %vm183_vm2, %v2731_v24  ;;  %4362 = vmatprep.subr.bf16.mxu0 %v4361_v37  ;;  %v3911_v24 = vld [vmem:[%s5272_s8 + $0x40] sm:$0xff] }
 0xd69   :  { %4260 = vmatmul.mubr.msk.f32.vlgmr.msra.gmra.mrb[38].mxu1 %vm183_vm2, %v2730_v25  ;;  %4364 = vmatpush3.bf16.msra.mxu0 %v4361_v37  ;;  %v3912_v25 = vld [vmem:[%s5272_s8 + $0x48] sm:$0xff] }
 0xd6a   :  { %v4485_v29 = vpop.eup %4484  ;;  %4268 = vmatpush3.msra.mxu1 %v3281_v28  ;;  %4269 = vmatprep.mubr.msk.f32.mxu1 %vm4575_vm1, %v4574_v8  ;;  %v3913_v28 = vld [vmem:[%s5272_s8 + $0x50] sm:$0xff] }
 0xd6b   :  { %v2732_v31 = vmul.f32 %v4485_v29, %v5107_v61  ;;  %4366 = vmatprep.subr.bf16.mxu0 %v4365_v41  ;;  %v4377_v29 = vpack.c.bf16 %v3912_v25, %v3911_v24  ;;  %v3926_v24 = vld [vmem:[%s5277_s13 + $0x1] ss:$0 sm:$0xff] }
 0xd6d   :  { %4270 = vmatmul.mubr.msk.f32.vlgmr.msra.gmra.mrb[40].mxu1 %vm183_vm2, %v2732_v31  ;;  %4368 = vmatpush3.bf16.msra.mxu0 %v4365_v41  ;;  %v3914_v31 = vld [vmem:[%s5272_s8 + $0x58] sm:$0xff] }
 0xd6e   :  { %4378 = vmatprep.subr.bf16.mxu0 %v4377_v29 }
 0xe2a   :  { %v2805_v33 = vpop.f32.mrb[24].mxu0 }
 0xe2b   :  { %v4236_v34 = vpop.f32.mrb[25].mxu0 }
 0xe2c   :  { %v3915_v34 = vld [vmem:[%s5272_s8 + $0x60] sm:$0xff] }
 0xe2d   :  { %v4385_v36 = vpack.c.bf16 %v3916_v35, %v3915_v34 }
 0xe2f   :  { %v2881_v38 = vpop.f32.mrb[34].mxu1 }
 0xe30   :  { %3038 = vrot.lane.b32.xlu0 %v2881_v38, %s5305_s16  ;;  %v4241_v8 = vpop.f32.mrb[35].mxu1 }
 0xe33   :  { %v2957_v42 = vpop.f32.mrb[26].mxu0 }
 0xe34   :  { %3042 = vrot.lane.b32.xlu1 %v2957_v42, %s5306_s18  ;;  %v4246_v43 = vpop.f32.mrb[27].mxu0 }
 0xe35   :  { %v3901_v43 = vld [vmem:[%s5274_s10 + $0x1] ss:$0 sm:$0xff] }
 0xe37   :  { %v3124_v44 = vpop.f32.mrb[28].mxu0 }
 0xe38   :  { %v3033_v45 = vpop.f32.mrb[36].mxu1  ;;  %v4256_v46 = vpop.f32.mrb[29].mxu0 }
 0xe39   :  { %3046 = vrot.lane.b32.xlu1 %v3033_v45, %s5307_s21  ;;  %v4251_v47 = vpop.f32.mrb[37].mxu1  ;;  %v3902_v45 = vld [vmem:[%s5275_s11 + $0x1] ss:$0 sm:$0xff] }
 0xe3b   :  { %v3276_v48 = vpop.f32.mrb[30].mxu0 }
 0xe3c   :  { %v3200_v49 = vpop.f32.mrb[38].mxu1  ;;  %v4266_v50 = vpop.f32.mrb[31].mxu0 }
 0xe3d   :  { %3357 = vrot.lane.b32.xlu0 %v3200_v49, %s5305_s16  ;;  %v4261_v51 = vpop.f32.mrb[39].mxu1 }
 0xe40   :  { %v3352_v52 = vpop.f32.mrb[40].mxu1 }
 0xe41   :  { %3361 = vrot.lane.b32.xlu0 %v3276_v48, %s5306_s18  ;;  %3365 = vrot.lane.b32.xlu1 %v3352_v52, %s5307_s21  ;;  %v4271_v53 = vpop.f32.mrb[41].mxu1  ;;  %v3917_v52 = vld [vmem:[%s5272_s8 + $0x70] sm:$0xff] }
 0xe42   :  { %v3918_v53 = vld [vmem:[%s5272_s8 + $0x78] sm:$0xff] }
 0xea2   :  { %v3039_v55 = vpop.permute.xlu0 %3038 }
 0xea3   :  { %v3049_v56 = vsel %vm183_vm2, %v2805_v33, %v3039_v55  ;;  %v4381_v33 = vpack.c.bf16 %v3914_v31, %v3913_v28  ;;  %v3908_v55 = vld [vmem:[%s5271_s7 + $0x1] ss:$0 sm:$0xff] }
 0xea6   :  { %v3043_v54 = vpop.permute.xlu1 %3042 }
 0xea7   :  { %v3050_v57 = vsel %vm1218_vm4, %v3049_v56, %v3043_v54  ;;  %v4389_v54 = vpack.c.bf16 %v3918_v53, %v3917_v52  ;;  %v3927_v52 = vld [vmem:[%s5278_s14] ss:$0 sm:$0xff] }
 0xeab   :  { %v3047_v58 = vpop.permute.xlu1 %3046 }
 0xeac   :  { %v3051_v59 = vsel %vm1220_vm5, %v3050_v57, %v3047_v58 }
 0xead   :  { %4280 = vmatprep.mubr.msk.f32.mxu0 %vm96_vm0, %v3051_v59 }
 0xeaf   :  { %v3358_v11 = vpop.permute.xlu0 %3357 }
 0xeb0   :  { %v3368_v60 = vsel %vm183_vm2, %v3124_v44, %v3358_v11 }
 0xeb3   :  { %v3362_v61 = vpop.permute.xlu0 %3361  ;;  %v3366_v62 = vpop.permute.xlu1 %3365 }
 0xeb4   :  { %v3369_v63 = vsel %vm1218_vm4, %v3368_v60, %v3362_v61  ;;  %v3920_v61 = vld [vmem:[%s5273_s9 + $0x1] ss:$0 sm:$0xff] }
 0xeb5   :  { %v3370_v0 = vsel %vm1220_vm5, %v3369_v63, %v3366_v62 }
 0xeb6   :  { %4281 = vmatmul.mubr.msk.f32.vlgmr.msra.gmra.mrb[32].mxu0 %vm96_vm0, %v3370_v0 }
 0xeb7   :  { %4380 = vmatpush3.bf16.msra.mxu0 %v4377_v29 }
 0xeb8   :  { %4382 = vmatprep.subr.bf16.mxu0 %v4381_v33 }
 0xebb   :  { %4384 = vmatpush3.bf16.msra.mxu0 %v4381_v33 }
 0xebc   :  { %4386 = vmatprep.subr.bf16.mxu0 %v4385_v36 }
 0xebf   :  { %4388 = vmatpush3.bf16.msra.mxu0 %v4385_v36 }
 0xec0   :  { %4390 = vmatprep.subr.bf16.mxu0 %v4389_v54 }
 0xec3   :  { %4392 = vmatpush3.bf16.msra.mxu0 %v4389_v54 }
 0xf89   :  { %v4282_v2 = vpop.f32.mrb[32].mxu0 }
 0xf8a   :  { %v3462_v3 = vadd.f32 %v4282_v2, %v3896_v1  ;;  %v3456_v4 = vpop.f32.mrb[33].mxu0 }
 0xf8b   :  { %v3457_v7 = vadd.f32 %v3896_v1, %v3456_v4 }
 0xf8c   :  { %v3466_v5 = vadd.f32 %v3462_v3, %v4991_v27 }
 0xf8d   :  { %v3465_v6 = vadd.f32 %v3457_v7, %v4989_v26  ;;  %v3903_v26 = vld [vmem:[%s5270_s6 + $0x20] sm:$0xff] }
 0xf8e   :  { %v3474_v9 = vsel %vm96_vm0, %v3466_v5, 0.0  ;;  %v4369_v20 = vpack.c.bf16 %v3904_v19, %v3903_v26 }
 0xf8f   :  { %3475 = vadd.xlane.f32.xlu1 %v3474_v9  ;;  %v3471_v10 = vsel %vm96_vm0, %v3465_v6, 0.0 }
 0xf90   :  { %3472 = vadd.xlane.f32.xlu0 %v3471_v10  ;;  %4370 = vmatprep.subr.bf16.mxu1 %v4369_v20 }
 0xf91   :  { %4372 = vmatpush3.bf16.msra.mxu1 %v4369_v20 }
 0xf92   :  { %4374 = vmatprep.subr.bf16.mxu1 %v4373_v23 }
 0xf95   :  { %4376 = vmatpush3.bf16.msra.mxu1 %v4373_v23 }
0x101c   :  { %v3476_v30 = vpop.xlane.xlu1 %3475 }
0x101d   :  { %v3478_v12 = vmul.f32 0.03125, %v3476_v30  ;;  %v3473_v14 = vpop.xlane.xlu0 %3472 }
0x101e   :  { %v3477_v15 = vmul.f32 0.03125, %v3473_v14 }
0x101f   :  { %v3480_v16 = vsub.f32 %v3466_v5, %v3478_v12 }
0x1020   :  { %v3479_v13 = vsub.f32 %v3465_v6, %v3477_v15 }
0x1021   :  { %v3482_v32 = vmul.f32 %v3480_v16, %v3480_v16 }
0x1022   :  { %v3481_v17 = vmul.f32 %v3479_v13, %v3479_v13 }
0x1023   :  { %v3486_v27 = vsel %vm96_vm0, %v3482_v32, 0.0 }
0x1024   :  { %v3483_v18 = vsel %vm96_vm0, %v3481_v17, 0.0 }
0x1025   :  { %3484 = vadd.xlane.f32.xlu0 %v3483_v18 }
0x1029   :  { %3487 = vadd.xlane.f32.xlu0 %v3486_v27 }
0x10b2   :  { %v3485_v37 = vpop.xlane.xlu0 %3484 }
0x10b3   :  { %v3489_v38 = vmul.f32 0.03125, %v3485_v37 }
0x10b5   :  { %v3491_v8 = vadd.f32 1e-05, %v3489_v38 }
0x10b6   :  { %v3488_v39 = vpop.xlane.xlu0 %3487 }
0x10b7   :  { %4486 = vrsqrt.f32 %v3491_v8  ;;  %v3490_v40 = vmul.f32 0.03125, %v3488_v39 }
0x10b9   :  { %v3492_v41 = vadd.f32 1e-05, %v3490_v40 }
0x10bb   :  { %4488 = vrsqrt.f32 %v3492_v41 }
0x10c1   :  { %v4487_v42 = vpop.eup %4486 }
0x10c2   :  { %v3495_v44 = vmul.f32 %v4487_v42, %v3479_v13 }
0x10c4   :  { %v3503_v46 = vmul.f32 %v3901_v43, %v3495_v44 }
0x10c5   :  { %v4489_v47 = vpop.eup %4488 }
0x10c6   :  { %v3496_v48 = vmul.f32 %v4489_v47, %v3480_v16  ;;  %v3511_v49 = vadd.f32 %v3902_v45, %v3503_v46 }
0x10c8   :  { %v3504_v50 = vmul.f32 %v3901_v43, %v3496_v48  ;;  %4291 = vmatprep.mubr.msk.f32.mxu1 %vm96_vm0, %v3511_v49 }
0x10ca   :  { %v3512_v51 = vadd.f32 %v3902_v45, %v3504_v50 }
0x10cc   :  { %4292 = vmatmul.mubr.msk.f32.vlgmr.msra.gmra.mrb[42].mxu1 %vm96_vm0, %v3512_v51 }
0x119f   :  { %v4293_v56 = vpop.f32.mrb[42].mxu1 }
0x11a0   :  { %v3604_v57 = vadd.f32 %v4293_v56, %v3908_v55  ;;  %v3598_v58 = vpop.f32.mrb[43].mxu1  ;;  %v3928_v56 = vld [vmem:[%s5279_s15] ss:$0 sm:$0xff] }
0x11a1   :  { %v3599_v59 = vadd.f32 %v3908_v55, %v3598_v58 }
0x11a2   :  { %v3608_v60 = vmax.f32 %v3604_v57, 0.0 }
0x11a3   :  { %v3607_v11 = vmax.f32 %v3599_v59, 0.0 }
0x11a5   :  { %4310 = vmatprep.mubr.msk.f32.mxu0 %vm1789_vm6, %v3607_v11 }
0x11a6   :  { %4311 = vmatmul.mubr.msk.f32.vlgmr.msra.gmra.mrb[34].mxu0 %vm1789_vm6, %v3608_v60 }
0x1279   :  { %v4312_v62 = vpop.f32.mrb[34].mxu0 }
0x127a   :  { %v3704_v63 = vadd.f32 %v4312_v62, %v3920_v61  ;;  %v3698_v0 = vpop.f32.mrb[35].mxu0 }
0x127b   :  { %v3699_v1 = vadd.f32 %v3920_v61, %v3698_v0 }
0x127c   :  { %v3708_v2 = vadd.f32 %v3704_v63, %v3512_v51 }
0x127d   :  { %v3707_v3 = vadd.f32 %v3699_v1, %v3511_v49 }
0x127e   :  { %v3716_v4 = vsel %vm96_vm0, %v3708_v2, 0.0 }
0x127f   :  { %3717 = vadd.xlane.f32.xlu0 %v3716_v4  ;;  %v3713_v7 = vsel %vm96_vm0, %v3707_v3, 0.0 }
0x1280   :  { %3714 = vadd.xlane.f32.xlu1 %v3713_v7 }
0x130c   :  { %v3718_v5 = vpop.xlane.xlu0 %3717 }
0x130d   :  { %v3720_v6 = vmul.f32 0.03125, %v3718_v5  ;;  %v3715_v9 = vpop.xlane.xlu1 %3714 }
0x130e   :  { %v3719_v10 = vmul.f32 0.03125, %v3715_v9 }
0x130f   :  { %v3722_v30 = vsub.f32 %v3708_v2, %v3720_v6 }
0x1310   :  { %v3721_v12 = vsub.f32 %v3707_v3, %v3719_v10 }
0x1311   :  { %v3724_v14 = vmul.f32 %v3722_v30, %v3722_v30 }
0x1312   :  { %v3723_v15 = vmul.f32 %v3721_v12, %v3721_v12 }
0x1313   :  { %v3728_v16 = vsel %vm96_vm0, %v3724_v14, 0.0 }
0x1314   :  { %3729 = vadd.xlane.f32.xlu0 %v3728_v16  ;;  %v3725_v13 = vsel %vm96_vm0, %v3723_v15, 0.0 }
0x1315   :  { %3726 = vadd.xlane.f32.xlu1 %v3725_v13 }
0x13a1   :  { %v3730_v17 = vpop.xlane.xlu0 %3729 }
0x13a2   :  { %v3732_v18 = vmul.f32 0.03125, %v3730_v17  ;;  %v3727_v32 = vpop.xlane.xlu1 %3726 }
0x13a3   :  { %v3731_v27 = vmul.f32 0.03125, %v3727_v32 }
0x13a4   :  { %v3734_v26 = vadd.f32 1e-05, %v3732_v18 }
0x13a5   :  { %v3733_v19 = vadd.f32 1e-05, %v3731_v27 }
0x13a6   :  { %4490 = vrsqrt.f32 %v3734_v26 }
0x13a7   :  { %4492 = vrsqrt.f32 %v3733_v19 }
0x13b0   :  { %v4491_v20 = vpop.eup %4490 }
0x13b1   :  { %v4493_v22 = vpop.eup %4492  ;;  %v3738_v23 = vmul.f32 %v4491_v20, %v3722_v30 }
0x13b2   :  { %v3737_v25 = vmul.f32 %v4493_v22, %v3721_v12 }
0x13b3   :  { %v3746_v28 = vmul.f32 %v3925_v21, %v3738_v23 }
0x13b4   :  { %v3745_v29 = vmul.f32 %v3925_v21, %v3737_v25 }
0x13b5   :  { %v3754_v31 = vadd.f32 %v3926_v24, %v3746_v28 }
0x13b6   :  { %v3753_v33 = vadd.f32 %v3926_v24, %v3745_v29 }
0x13b7   :  { %v3760_v34 = vsel %vm96_vm0, %v3754_v31, 0.0 }
0x13b8   :  { %3761 = vadd.xlane.f32.xlu0 %v3760_v34  ;;  %v3757_v35 = vsel %vm96_vm0, %v3753_v33, 0.0 }
0x13b9   :  { %3758 = vadd.xlane.f32.xlu1 %v3757_v35 }
0x1445   :  { %v3762_v36 = vpop.xlane.xlu0 %3761 }
0x1446   :  { %v3764_v37 = vmul.f32 0.03125, %v3762_v36  ;;  %v3759_v38 = vpop.xlane.xlu1 %3758 }
0x1447   :  { %v3763_v8 = vmul.f32 0.03125, %v3759_v38 }
0x1448   :  { %v3766_v39 = vsub.f32 %v3754_v31, %v3764_v37 }
0x1449   :  { %v3765_v40 = vsub.f32 %v3753_v33, %v3763_v8 }
0x144a   :  { %v3768_v41 = vmul.f32 %v3766_v39, %v3766_v39 }
0x144b   :  { %v3767_v42 = vmul.f32 %v3765_v40, %v3765_v40 }
0x144c   :  { %v3772_v43 = vsel %vm96_vm0, %v3768_v41, 0.0 }
0x144d   :  { %3773 = vadd.xlane.f32.xlu0 %v3772_v43  ;;  %v3769_v44 = vsel %vm96_vm0, %v3767_v42, 0.0 }
0x144e   :  { %3770 = vadd.xlane.f32.xlu1 %v3769_v44 }
0x14da   :  { %v3774_v45 = vpop.xlane.xlu0 %3773 }
0x14db   :  { %v3776_v46 = vmul.f32 0.03125, %v3774_v45  ;;  %v3771_v47 = vpop.xlane.xlu1 %3770 }
0x14dc   :  { %v3775_v48 = vmul.f32 0.03125, %v3771_v47 }
0x14dd   :  { %v3778_v49 = vadd.f32 1e-05, %v3776_v46 }
0x14de   :  { %v3777_v50 = vadd.f32 1e-05, %v3775_v48 }
0x14df   :  { %4494 = vrsqrt.f32 %v3778_v49 }
0x14e0   :  { %4496 = vrsqrt.f32 %v3777_v50 }
0x14e9   :  { %v4495_v51 = vpop.eup %4494 }
0x14ea   :  { %v4497_v53 = vpop.eup %4496  ;;  %v3782_v54 = vmul.f32 %v4495_v51, %v3766_v39 }
0x14eb   :  { %v3781_v55 = vmul.f32 %v4497_v53, %v3765_v40 }
0x14ec   :  { %v3790_v57 = vmul.f32 %v3927_v52, %v3782_v54 }
0x14ed   :  { %v3789_v58 = vmul.f32 %v3927_v52, %v3781_v55 }
0x14ee   :  { %v3798_v59 = vadd.f32 %v3928_v56, %v3790_v57 }
0x14ef   :  { %v3797_v11 = vadd.f32 %v3928_v56, %v3789_v58 }
0x14f0   :  { %3800 = vst.msk [vmem:[#allocation7 + $0x8] sm:$0xff] %vm96_vm0, %v3798_v59 }
0x14f1   :  { %3799 = vst.msk [vmem:[#allocation7] sm:$0xff] %vm96_vm0, %v3797_v11 }
0x14f2   :  { %4553 = shalt.err (!%p4550_p6)
}
0x14f3   :  { %s5308_s1 = sld [smem:[#allocation12_spill]] }
0x14f9   :  { %s4554_s6 = scalar_lea.hbm %s5308_s1, 256 }
0x14fa   :  { %p4555_p7 = scmp.ne.s32.totalorder %s5308_s1, %s4554_s6  ;;  %p4558_p8 = scmp.lt.u32.totalorder %s4554_s6, %s5308_s1 }
0x14fc   :  { %p4560_p9 = pnand %p4558_p8, %p4555_p7 }
0x14fe   :  { %4563 = shalt.err (!%p4560_p9)
}
0x14ff   :  { %s5309_s5 = smov 128  }
0x1500   :  { %3812 = dma.vmem_to_hbm [thread:$0]  %s3807_s17, 256, %s5308_s1, [#allocation4], %s5309_s5, %s5309_s5, %s5305_s16  }
0x1501   :  { %4568 = dma.done.wait [#allocation4], 256  }
0x1502   :  { %4569 = vsyncadd [#allocation4], 4294967040 }
0x1503   :  { %3816 = vsyncpa [#allocation3], 1 }
0x1504   :  { %3817 = vsyncpa [#allocation6], 1 }
0x1505   :  { %3818 = vsyncpa [#allocation4], 1 }

</bundles_post_ra>
